<compile_context>
chip_gen: v7x
topology: tpu7x:2x2x1
jax: 0.10.0
libtpu: 0.0.40
codegen_flags: <defaults>
</compile_context>

<pallas_src>
import functools

import jax
import jax.numpy as jnp
import numpy as np
from jax import lax
from jax.experimental import pallas as pl
from jax.experimental.pallas import tpu as pltpu

_HIGHEST = lax.Precision.HIGHEST


# ----------------------------------------------------------------------------
# Pallas kernel
# ----------------------------------------------------------------------------
def _horiconv_kernel(x_ref, ms_ref, tw_ref, o_ref, *, H, W):
    # x block      : (NB, Cc, H*W)      -- channels-first, lanes = H*W
    # merger slab  : (2, CP, ML)        -- [mw | bias-in-last-lane] per 1x1 conv
    # tower slab   : (6, CP, 3*CP + 1)  -- BN-folded conv weights + bias lane
    # out block    : (1, Cout, NB*W)    -- lane-dense, single store
    NB = x_ref.shape[0]
    Cc = x_ref.shape[1]
    HW = H * W
    CP = tw_ref.shape[1]
    K3 = 3 * CP
    ML = ms_ref.shape[2]
    Cout = o_ref.shape[1]
    L = NB * W                       # conv-tower lane width
    Lm = NB * HW                     # merger lane width

    # ---- merger: one matmul pair for the whole step --------------------------
    if NB == 1:
        xs = x_ref[0]                                            # (Cc, HW)
    else:
        xs = jnp.concatenate([x_ref[n] for n in range(NB)], axis=1)  # (Cc, NB*HW)

    m0 = ms_ref[0]
    m1 = ms_ref[1]
    mw1, mb1 = m0[:, :Cc], m0[:, ML - 1:ML]                      # (CP,Cc),(CP,1)
    mw2, mb2 = m1[:, :CP], m1[:, ML - 1:ML]                      # (CP,CP),(CP,1)

    t = jax.nn.sigmoid(jnp.dot(mw1, xs, precision=_HIGHEST,
                               preferred_element_type=jnp.float32) + mb1)
    m = jnp.dot(mw2, t, precision=_HIGHEST,
                preferred_element_type=jnp.float32) + mb2        # (CP, NB*HW)

    # ---- max over height (lanes are p = n*HW + h*W + w) ----------------------
    if (H & (H - 1)) == 0:
        # power-of-two H: log2(H) XLU lane-roll folds; the fold reads for the
        # lanes that feed the result (h < hh) never cross an image boundary.
        hh = H
        while hh > 1:
            hh //= 2
            m = jnp.maximum(m, pltpu.roll(m, shift=Lm - hh * W, axis=1))
        cols = [m[:, n * HW:n * HW + W] for n in range(NB)]
    else:
        # generic H: running max over static lane slices.
        cols = []
        for n in range(NB):
            base = n * HW
            acc = m[:, base:base + W]
            for hh in range(1, H):
                acc = jnp.maximum(acc, m[:, base + hh * W:base + (hh + 1) * W])
            cols.append(acc)
    h = cols[0] if NB == 1 else jnp.concatenate(cols, axis=1)    # (CP, NB*W)

    # ---- conv tower (Conv1d k=3 pad=1 as fused (CP,3CP)@(3CP,L) matmul) ------
    lane = lax.broadcasted_iota(jnp.int32, (1, L), 1)
    first_col = (lane % W) == 0                  # w-1 falls outside this image
    last_col = (lane % W) == (W - 1)             # w+1 falls outside this image

    def shift3(v):                               # (CP, L) -> (3*CP, L)
        vm1 = jnp.where(first_col, 0.0, pltpu.roll(v, shift=1, axis=1))
        vp1 = jnp.where(last_col, 0.0, pltpu.roll(v, shift=L - 1, axis=1))
        return jnp.concatenate([vm1, v, vp1], axis=0)

    def cbr(v, stage):
        slab = tw_ref[stage]                     # (CP, 3*CP+1)
        w = slab[:, :K3]
        b = slab[:, K3:K3 + 1]
        y = jnp.dot(w, shift3(v), precision=_HIGHEST,
                    preferred_element_type=jnp.float32) + b
        return jnp.maximum(y, 0.0)

    h = cbr(h, 0)                                # reduce_conv
    r = cbr(h, 1)                                # conv1
    r = cbr(r, 2)
    h = r + h
    r = cbr(h, 3)                                # conv2
    r = cbr(r, 4)
    h = r + h
    h = cbr(h, 5)                                # out_conv
    # h: (CP, NB*W); padded rows (if any) are exactly zero.

    o_ref[0] = h[:Cout].astype(o_ref.dtype)      # single lane-dense store


# ----------------------------------------------------------------------------
# Host wrapper
# ----------------------------------------------------------------------------
def horiconv_forward(x_nchw, pe_nchw, params, eps=1e-5, batch_block=None):
    if pe_nchw is not None:
        x_nchw = jnp.concatenate([x_nchw, pe_nchw], axis=1)
    N, Cc, H, W = x_nchw.shape
    # Free reshape (no HBM transpose): channels on sublanes, H*W on lanes.
    x = x_nchw.reshape(N, Cc, H * W).astype(jnp.float32)

    if batch_block is None:
        # Fold the whole batch into the lane dimension (single grid step) unless
        # a 2-way 'parallel' split (keeps both v7x TensorCores busy) still gives
        # each step >= 256 lanes of conv-tower work.
        batch_block = N // 2 if (N % 2 == 0 and (N // 2) * W >= 256) else N
    NB = batch_block
    assert N % NB == 0, "batch_block must divide the batch size"
    G = N // NB

    Cin = params['m1_w'].shape[0]
    Mid = params['rc_w'].shape[0]
    Cout = params['out_w'].shape[0]
    CP = int(-(-max(Cin, Mid, Cout) // 8) * 8)   # common padded channel count

    def fold_bn(gamma, beta, mean, var, conv_bias=None):
        s = gamma / jnp.sqrt(var + eps)
        b = beta - mean * s
        if conv_bias is not None:
            b = b + conv_bias * s
        return s.astype(jnp.float32), b.astype(jnp.float32)

    def fuse_conv(w, bn, conv_bias=None):
        # PyTorch Conv1d weight (Co, Ci, 3): fold BN scale, zero-pad each tap
        # block to CP channels, append bias as the last lane -> (CP, 3*CP + 1).
        s, b = fold_bn(*bn, conv_bias=conv_bias)
        co, ci, _ = w.shape
        wt = jnp.transpose(w.astype(jnp.float32), (2, 0, 1)) * s[None, :, None]
        wp = jnp.zeros((3, CP, CP), jnp.float32).at[:, :co, :ci].set(wt)
        wf = jnp.transpose(wp, (1, 0, 2)).reshape(CP, 3 * CP)   # [tap0|tap1|tap2]
        bp = jnp.zeros((CP, 1), jnp.float32).at[:co, 0].set(b)
        return jnp.concatenate([wf, bp], axis=1)                 # (CP, 3*CP + 1)

    tower = jnp.stack([
        fuse_conv(params['rc_w'], params['rc_bn']),
        fuse_conv(params['c1a_w'], params['c1a_bn']),
        fuse_conv(params['c1b_w'], params['c1b_bn']),
        fuse_conv(params['c2a_w'], params['c2a_bn']),
        fuse_conv(params['c2b_w'], params['c2b_bn']),
        fuse_conv(params['out_w'], params['out_bn'], conv_bias=params['out_b']),
    ], axis=0)                                                   # (6, CP, 3*CP+1)

    # Merger slab: slot 0 = [mw1 | b1], slot 1 = [mw2 (zero-padded to CPxCP) | b2].
    # Zero padding keeps padded channels exactly zero through the whole tower.
    ML = max(Cc, CP) + 1
    merger = jnp.zeros((2, CP, ML), jnp.float32)
    merger = merger.at[0, :Cin, :Cc].set(params['m1_w'][:, :, 0, 0].astype(jnp.float32))
    merger = merger.at[0, :Cin, ML - 1].set(params['m1_b'].astype(jnp.float32))
    merger = merger.at[1, :Cin, :Cin].set(params['m2_w'][:, :, 0, 0].astype(jnp.float32))
    merger = merger.at[1, :Cin, ML - 1].set(params['m2_b'].astype(jnp.float32))

    flops_img = (2 * CP * Cc * H * W + 2 * CP * CP * H * W       # merger
                 + 6 * 2 * CP * 3 * CP * W)                      # conv tower
    cost = pl.CostEstimate(
        flops=int(N * flops_img),
        transcendentals=int(N * CP * H * W),
        bytes_accessed=int(4 * (x.size + N * Cout * W
                                + int(merger.size) + int(tower.size))))

    # Raise the scoped-VMEM limit only when the blocks are actually big
    # (production H*W); cap below v7x's 64 MiB physical VMEM.
    vmem_est = 4 * (2 * NB * Cc * H * W + 2 * Cout * NB * W
                    + 2 * (int(merger.size) + int(tower.size)))
    cp_kwargs = dict(dimension_semantics=("parallel",))
    if vmem_est > 24 * 1024 * 1024:
        cp_kwargs["vmem_limit_bytes"] = min(int(vmem_est * 3 // 2),
                                            60 * 1024 * 1024)

    out = pl.pallas_call(
        functools.partial(_horiconv_kernel, H=H, W=W),
        out_shape=jax.ShapeDtypeStruct((G, Cout, NB * W), jnp.float32),
        grid=(G,),
        in_specs=[
            pl.BlockSpec((NB, Cc, H * W), lambda g: (g, 0, 0)),
            pl.BlockSpec(merger.shape, lambda g: (0, 0, 0)),
            pl.BlockSpec(tower.shape, lambda g: (0, 0, 0)),
        ],
        out_specs=pl.BlockSpec((1, Cout, NB * W), lambda g: (g, 0, 0)),
        compiler_params=pltpu.CompilerParams(**cp_kwargs),
        cost_estimate=cost,
    )(x, merger, tower)

    # Lane-dense kernel output (G, Cout, NB*W) -> PyTorch layout (N, Cout, W).
    return out.reshape(G, Cout, NB, W).transpose(0, 2, 1, 3).reshape(N, Cout, W)


# ----------------------------------------------------------------------------
# Plain-JAX reference (mirrors the PyTorch NCHW / NCW semantics)
# ----------------------------------------------------------------------------
def horiconv_reference(x, pe, p, eps=1e-5):
    if pe is not None:
        x = jnp.concatenate([x, pe], axis=1)

    def conv1x1(x, w, b):
        return (jnp.einsum('nchw,oc->nohw', x, w[:, :, 0, 0],
                           precision=_HIGHEST)
                + b[None, :, None, None])

    h = conv1x1(x, p['m1_w'], p['m1_b'])
    h = jax.nn.sigmoid(h)
    h = conv1x1(h, p['m2_w'], p['m2_b'])
    h = jnp.max(h, axis=2)                                           # (N, C, W)

    def conv1d(x, w):
        return lax.conv_general_dilated(
            x, w, window_strides=(1,), padding=[(1, 1)],
            dimension_numbers=('NCH', 'OIH', 'NCH'),
            precision=_HIGHEST)

    def bn(x, g, b, m, v):
        return ((x - m[None, :, None]) / jnp.sqrt(v[None, :, None] + eps)
                * g[None, :, None] + b[None, :, None])

    def cbr(x, w, bn_params, bias=None):
        y = conv1d(x, w)
        if bias is not None:
            y = y + bias[None, :, None]
        return jnp.maximum(bn(y, *bn_params), 0.0)

    h = cbr(h, p['rc_w'], p['rc_bn'])
    r = cbr(h, p['c1a_w'], p['c1a_bn'])
    r = cbr(r, p['c1b_w'], p['c1b_bn'])
    h = r + h
    r = cbr(h, p['c2a_w'], p['c2a_bn'])
    r = cbr(r, p['c2b_w'], p['c2b_bn'])
    h = r + h
    h = cbr(h, p['out_w'], p['out_bn'], bias=p['out_b'])
    return h                                                          # (N, Out, W)


# ----------------------------------------------------------------------------
# Deterministic parameter init
# ----------------------------------------------------------------------------
def init_params(key, cin, cat, mid, cout):
    keys = iter(jax.random.split(key, 40))

    def w(shape, scale=0.2):
        return jax.random.normal(next(keys), shape, jnp.float32) * scale

    def bn(c):
        g = 1.0 + 0.1 * jax.random.normal(next(keys), (c,), jnp.float32)
        b = 0.1 * jax.random.normal(next(keys), (c,), jnp.float32)
        m = 0.1 * jax.random.normal(next(keys), (c,), jnp.float32)
        v = jnp.abs(jax.random.normal(next(keys), (c,), jnp.float32)) + 0.5
        return (g, b, m, v)

    return dict(
        m1_w=w((cin, cin + cat, 1, 1)), m1_b=w((cin,)),
        m2_w=w((cin, cin, 1, 1)), m2_b=w((cin,)),
        rc_w=w((mid, cin, 3)), rc_bn=bn(mid),
        c1a_w=w((mid, mid, 3)), c1a_bn=bn(mid),
        c1b_w=w((mid, mid, 3)), c1b_bn=bn(mid),
        c2a_w=w((mid, mid, 3)), c2a_bn=bn(mid),
        c2b_w=w((mid, mid, 3)), c2b_bn=bn(mid),
        out_w=w((cout, mid, 3)), out_b=w((cout,)), out_bn=bn(cout),
    )


if __name__ == "__main__":
    N, CIN, CAT, MID, COUT, H, W = 2, 8, 4, 16, 16, 16, 16

    key = jax.random.PRNGKey(0)
    kx, kpe, kp = jax.random.split(key, 3)
    x = jax.random.normal(kx, (N, CIN, H, W), jnp.float32)    # NCHW, like PyTorch
    pe = jax.random.normal(kpe, (N, CAT, H, W), jnp.float32)  # position embedding
    params = init_params(kp, CIN, CAT, MID, COUT)

    out = horiconv_forward(x, pe, params)
    out = jax.block_until_ready(out)

    ref = horiconv_reference(x, pe, params)
    np.testing.assert_allclose(np.asarray(out), np.asarray(ref),
                               rtol=2e-4, atol=2e-4)
    assert out.shape == (N, COUT, W)
    print("KERNEL_OK")
</pallas_src>

<mosaic_0001>
module attributes {stable_mosaic.version = 11 : i64} {
  func.func @_horiconv_kernel(%arg0: i32, %arg1: memref<2x12x256xf32, #tpu.memory_space<vmem>>, %arg2: memref<2x16x17xf32, #tpu.memory_space<vmem>>, %arg3: memref<6x16x49xf32, #tpu.memory_space<vmem>>, %arg4: memref<1x16x32xf32, #tpu.memory_space<vmem>>) attributes {dimension_semantics = [#tpu.dimension_semantics<parallel>], iteration_bounds = array<i64: 1>, scalar_prefetch = 0 : i64, scratch_operands = 0 : i64, tpu.core_type = #tpu.core_type<tc>, window_params = [{transform_indices = @transform_0, window_bounds = array<i64: 2, 12, 256>}, {pipeline_mode = #tpu.pipeline_mode<synchronous>, transform_indices = @transform_1, window_bounds = array<i64: 2, 16, 17>}, {pipeline_mode = #tpu.pipeline_mode<synchronous>, transform_indices = @transform_2, window_bounds = array<i64: 6, 16, 49>}, {transform_indices = @transform_3, window_bounds = array<i64: 1, 16, 32>}]} {
    %c0 = arith.constant 0 : index
    %c0_0 = arith.constant 0 : index
    %c0_1 = arith.constant 0 : index
    %0 = vector.load %arg1[%c0, %c0_0, %c0_1] : memref<2x12x256xf32, #tpu.memory_space<vmem>>, vector<1x12x256xf32>
    %1 = vector.shape_cast %0 : vector<1x12x256xf32> to vector<12x256xf32>
    %c1 = arith.constant 1 : index
    %c0_2 = arith.constant 0 : index
    %c0_3 = arith.constant 0 : index
    %2 = vector.load %arg1[%c1, %c0_2, %c0_3] : memref<2x12x256xf32, #tpu.memory_space<vmem>>, vector<1x12x256xf32>
    %3 = vector.shape_cast %2 : vector<1x12x256xf32> to vector<12x256xf32>
    %4 = tpu.concatenate %1, %3 in 1 : vector<12x256xf32>, vector<12x256xf32> -> vector<12x512xf32>
    %c0_4 = arith.constant 0 : index
    %c0_5 = arith.constant 0 : index
    %c0_6 = arith.constant 0 : index
    %5 = vector.load %arg2[%c0_4, %c0_5, %c0_6] : memref<2x16x17xf32, #tpu.memory_space<vmem>>, vector<1x16x17xf32>
    %6 = vector.shape_cast %5 : vector<1x16x17xf32> to vector<16x17xf32>
    %c1_7 = arith.constant 1 : index
    %c0_8 = arith.constant 0 : index
    %c0_9 = arith.constant 0 : index
    %7 = vector.load %arg2[%c1_7, %c0_8, %c0_9] : memref<2x16x17xf32, #tpu.memory_space<vmem>>, vector<1x16x17xf32>
    %8 = vector.shape_cast %7 : vector<1x16x17xf32> to vector<16x17xf32>
    %9 = vector.extract_strided_slice %6 {offsets = [0, 0], sizes = [16, 12], strides = [1, 1]} : vector<16x17xf32> to vector<16x12xf32>
    %10 = vector.extract_strided_slice %6 {offsets = [0, 16], sizes = [16, 1], strides = [1, 1]} : vector<16x17xf32> to vector<16x1xf32>
    %11 = vector.extract_strided_slice %8 {offsets = [0, 0], sizes = [16, 16], strides = [1, 1]} : vector<16x17xf32> to vector<16x16xf32>
    %12 = vector.extract_strided_slice %8 {offsets = [0, 16], sizes = [16, 1], strides = [1, 1]} : vector<16x17xf32> to vector<16x1xf32>
    %cst = arith.constant dense<0.000000e+00> : vector<16x512xf32>
    %13 = tpu.matmul %9, %4, %cst {dimension_numbers = #tpu.dot_dimension_numbers<[1], [0], [0], [1], [0, 0, 1, 1], [], []>, precision = #tpu.contract_precision<fp32>} : vector<16x12xf32>, vector<12x512xf32>, vector<16x512xf32> -> vector<16x512xf32>
    %14 = vector.broadcast %10 : vector<16x1xf32> to vector<16x512xf32>
    %15 = arith.addf %13, %14 : vector<16x512xf32>
    %16 = arith.negf %15 : vector<16x512xf32>
    %17 = math.exp %16 : vector<16x512xf32>
    %cst_10 = arith.constant 1.000000e+00 : f32
    %18 = vector.broadcast %cst_10 : f32 to vector<16x512xf32>
    %19 = arith.addf %18, %17 : vector<16x512xf32>
    %20 = arith.divf %18, %19 : vector<16x512xf32>
    %cst_11 = arith.constant dense<0.000000e+00> : vector<16x512xf32>
    %21 = tpu.matmul %11, %20, %cst_11 {dimension_numbers = #tpu.dot_dimension_numbers<[1], [0], [0], [1], [0, 0, 1, 1], [], []>, precision = #tpu.contract_precision<fp32>} : vector<16x16xf32>, vector<16x512xf32>, vector<16x512xf32> -> vector<16x512xf32>
    %22 = vector.broadcast %12 : vector<16x1xf32> to vector<16x512xf32>
    %23 = arith.addf %21, %22 : vector<16x512xf32>
    %c384_i32 = arith.constant 384 : i32
    %24 = tpu.dynamic_rotate %23 by %c384_i32 dim 1 : vector<16x512xf32>, i32 -> vector<16x512xf32>
    %25 = arith.maximumf %23, %24 : vector<16x512xf32>
    %c448_i32 = arith.constant 448 : i32
    %26 = tpu.dynamic_rotate %25 by %c448_i32 dim 1 : vector<16x512xf32>, i32 -> vector<16x512xf32>
    %27 = arith.maximumf %25, %26 : vector<16x512xf32>
    %c480_i32 = arith.constant 480 : i32
    %28 = tpu.dynamic_rotate %27 by %c480_i32 dim 1 : vector<16x512xf32>, i32 -> vector<16x512xf32>
    %29 = arith.maximumf %27, %28 : vector<16x512xf32>
    %c496_i32 = arith.constant 496 : i32
    %30 = tpu.dynamic_rotate %29 by %c496_i32 dim 1 : vector<16x512xf32>, i32 -> vector<16x512xf32>
    %31 = arith.maximumf %29, %30 : vector<16x512xf32>
    %32 = vector.extract_strided_slice %31 {offsets = [0, 0], sizes = [16, 16], strides = [1, 1]} : vector<16x512xf32> to vector<16x16xf32>
    %33 = vector.extract_strided_slice %31 {offsets = [0, 256], sizes = [16, 16], strides = [1, 1]} : vector<16x512xf32> to vector<16x16xf32>
    %34 = tpu.concatenate %32, %33 in 1 : vector<16x16xf32>, vector<16x16xf32> -> vector<16x32xf32>
    %35 = tpu.iota {dimensions = array<i32: 1>} : vector<1x32xi32>
    %c16_i32 = arith.constant 16 : i32
    %c0_i32 = arith.constant 0 : i32
    %36 = arith.cmpi eq, %c16_i32, %c0_i32 : i32
    %c1_i32 = arith.constant 1 : i32
    %37 = arith.select %36, %c1_i32, %c16_i32 : i32
    %38 = vector.broadcast %37 : i32 to vector<1x32xi32>
    %39 = arith.remsi %35, %38 : vector<1x32xi32>
    %c0_i32_12 = arith.constant 0 : i32
    %40 = vector.broadcast %c0_i32_12 : i32 to vector<1x32xi32>
    %41 = arith.cmpi ne, %39, %40 : vector<1x32xi32>
    %c0_i32_13 = arith.constant 0 : i32
    %42 = vector.broadcast %c0_i32_13 : i32 to vector<1x32xi32>
    %43 = arith.cmpi slt, %39, %42 : vector<1x32xi32>
    %c0_i32_14 = arith.constant 0 : i32
    %44 = arith.cmpi slt, %37, %c0_i32_14 : i32
    %45 = vector.broadcast %44 : i1 to vector<1x32xi1>
    %46 = vector.broadcast %45 : vector<1x32xi1> to vector<1x32xi1>
    %47 = arith.xori %43, %46 : vector<1x32xi1>
    %48 = arith.andi %47, %41 : vector<1x32xi1>
    %49 = vector.broadcast %37 : i32 to vector<1x32xi32>
    %50 = arith.addi %39, %49 : vector<1x32xi32>
    %51 = arith.select %48, %50, %39 : vector<1x32xi1>, vector<1x32xi32>
    %c0_i32_15 = arith.constant 0 : i32
    %52 = vector.broadcast %c0_i32_15 : i32 to vector<1x32xi32>
    %53 = arith.cmpi eq, %51, %52 : vector<1x32xi32>
    %c16_i32_16 = arith.constant 16 : i32
    %c0_i32_17 = arith.constant 0 : i32
    %54 = arith.cmpi eq, %c16_i32_16, %c0_i32_17 : i32
    %c1_i32_18 = arith.constant 1 : i32
    %55 = arith.select %54, %c1_i32_18, %c16_i32_16 : i32
    %56 = vector.broadcast %55 : i32 to vector<1x32xi32>
    %57 = arith.remsi %35, %56 : vector<1x32xi32>
    %c0_i32_19 = arith.constant 0 : i32
    %58 = vector.broadcast %c0_i32_19 : i32 to vector<1x32xi32>
    %59 = arith.cmpi ne, %57, %58 : vector<1x32xi32>
    %c0_i32_20 = arith.constant 0 : i32
    %60 = vector.broadcast %c0_i32_20 : i32 to vector<1x32xi32>
    %61 = arith.cmpi slt, %57, %60 : vector<1x32xi32>
    %c0_i32_21 = arith.constant 0 : i32
    %62 = arith.cmpi slt, %55, %c0_i32_21 : i32
    %63 = vector.broadcast %62 : i1 to vector<1x32xi1>
    %64 = vector.broadcast %63 : vector<1x32xi1> to vector<1x32xi1>
    %65 = arith.xori %61, %64 : vector<1x32xi1>
    %66 = arith.andi %65, %59 : vector<1x32xi1>
    %67 = vector.broadcast %55 : i32 to vector<1x32xi32>
    %68 = arith.addi %57, %67 : vector<1x32xi32>
    %69 = arith.select %66, %68, %57 : vector<1x32xi1>, vector<1x32xi32>
    %c15_i32 = arith.constant 15 : i32
    %70 = vector.broadcast %c15_i32 : i32 to vector<1x32xi32>
    %71 = arith.cmpi eq, %69, %70 : vector<1x32xi32>
    %c0_22 = arith.constant 0 : index
    %c0_23 = arith.constant 0 : index
    %c0_24 = arith.constant 0 : index
    %72 = vector.load %arg3[%c0_22, %c0_23, %c0_24] : memref<6x16x49xf32, #tpu.memory_space<vmem>>, vector<1x16x49xf32>
    %73 = vector.shape_cast %72 : vector<1x16x49xf32> to vector<16x49xf32>
    %74 = vector.extract_strided_slice %73 {offsets = [0, 0], sizes = [16, 48], strides = [1, 1]} : vector<16x49xf32> to vector<16x48xf32>
    %75 = vector.extract_strided_slice %73 {offsets = [0, 48], sizes = [16, 1], strides = [1, 1]} : vector<16x49xf32> to vector<16x1xf32>
    %c1_i32_25 = arith.constant 1 : i32
    %76 = tpu.dynamic_rotate %34 by %c1_i32_25 dim 1 : vector<16x32xf32>, i32 -> vector<16x32xf32>
    %cst_26 = arith.constant 0.000000e+00 : f32
    %77 = vector.shape_cast %53 : vector<1x32xi1> to vector<1x32xi1>
    %78 = vector.broadcast %77 : vector<1x32xi1> to vector<16x32xi1>
    %79 = vector.broadcast %cst_26 : f32 to vector<16x32xf32>
    %80 = arith.select %78, %79, %76 : vector<16x32xi1>, vector<16x32xf32>
    %c31_i32 = arith.constant 31 : i32
    %81 = tpu.dynamic_rotate %34 by %c31_i32 dim 1 : vector<16x32xf32>, i32 -> vector<16x32xf32>
    %cst_27 = arith.constant 0.000000e+00 : f32
    %82 = vector.shape_cast %71 : vector<1x32xi1> to vector<1x32xi1>
    %83 = vector.broadcast %82 : vector<1x32xi1> to vector<16x32xi1>
    %84 = vector.broadcast %cst_27 : f32 to vector<16x32xf32>
    %85 = arith.select %83, %84, %81 : vector<16x32xi1>, vector<16x32xf32>
    %86 = tpu.concatenate %80, %34, %85 in 0 : vector<16x32xf32>, vector<16x32xf32>, vector<16x32xf32> -> vector<48x32xf32>
    %cst_28 = arith.constant dense<0.000000e+00> : vector<16x32xf32>
    %87 = tpu.matmul %74, %86, %cst_28 {dimension_numbers = #tpu.dot_dimension_numbers<[1], [0], [0], [1], [0, 0, 1, 1], [], []>, precision = #tpu.contract_precision<fp32>} : vector<16x48xf32>, vector<48x32xf32>, vector<16x32xf32> -> vector<16x32xf32>
    %88 = vector.broadcast %75 : vector<16x1xf32> to vector<16x32xf32>
    %89 = arith.addf %87, %88 : vector<16x32xf32>
    %cst_29 = arith.constant 0.000000e+00 : f32
    %90 = vector.broadcast %cst_29 : f32 to vector<16x32xf32>
    %91 = arith.maximumf %89, %90 : vector<16x32xf32>
    %c1_30 = arith.constant 1 : index
    %c0_31 = arith.constant 0 : index
    %c0_32 = arith.constant 0 : index
    %92 = vector.load %arg3[%c1_30, %c0_31, %c0_32] : memref<6x16x49xf32, #tpu.memory_space<vmem>>, vector<1x16x49xf32>
    %93 = vector.shape_cast %92 : vector<1x16x49xf32> to vector<16x49xf32>
    %94 = vector.extract_strided_slice %93 {offsets = [0, 0], sizes = [16, 48], strides = [1, 1]} : vector<16x49xf32> to vector<16x48xf32>
    %95 = vector.extract_strided_slice %93 {offsets = [0, 48], sizes = [16, 1], strides = [1, 1]} : vector<16x49xf32> to vector<16x1xf32>
    %c1_i32_33 = arith.constant 1 : i32
    %96 = tpu.dynamic_rotate %91 by %c1_i32_33 dim 1 : vector<16x32xf32>, i32 -> vector<16x32xf32>
    %cst_34 = arith.constant 0.000000e+00 : f32
    %97 = vector.shape_cast %53 : vector<1x32xi1> to vector<1x32xi1>
    %98 = vector.broadcast %97 : vector<1x32xi1> to vector<16x32xi1>
    %99 = vector.broadcast %cst_34 : f32 to vector<16x32xf32>
    %100 = arith.select %98, %99, %96 : vector<16x32xi1>, vector<16x32xf32>
    %c31_i32_35 = arith.constant 31 : i32
    %101 = tpu.dynamic_rotate %91 by %c31_i32_35 dim 1 : vector<16x32xf32>, i32 -> vector<16x32xf32>
    %cst_36 = arith.constant 0.000000e+00 : f32
    %102 = vector.shape_cast %71 : vector<1x32xi1> to vector<1x32xi1>
    %103 = vector.broadcast %102 : vector<1x32xi1> to vector<16x32xi1>
    %104 = vector.broadcast %cst_36 : f32 to vector<16x32xf32>
    %105 = arith.select %103, %104, %101 : vector<16x32xi1>, vector<16x32xf32>
    %106 = tpu.concatenate %100, %91, %105 in 0 : vector<16x32xf32>, vector<16x32xf32>, vector<16x32xf32> -> vector<48x32xf32>
    %cst_37 = arith.constant dense<0.000000e+00> : vector<16x32xf32>
    %107 = tpu.matmul %94, %106, %cst_37 {dimension_numbers = #tpu.dot_dimension_numbers<[1], [0], [0], [1], [0, 0, 1, 1], [], []>, precision = #tpu.contract_precision<fp32>} : vector<16x48xf32>, vector<48x32xf32>, vector<16x32xf32> -> vector<16x32xf32>
    %108 = vector.broadcast %95 : vector<16x1xf32> to vector<16x32xf32>
    %109 = arith.addf %107, %108 : vector<16x32xf32>
    %cst_38 = arith.constant 0.000000e+00 : f32
    %110 = vector.broadcast %cst_38 : f32 to vector<16x32xf32>
    %111 = arith.maximumf %109, %110 : vector<16x32xf32>
    %c2 = arith.constant 2 : index
    %c0_39 = arith.constant 0 : index
    %c0_40 = arith.constant 0 : index
    %112 = vector.load %arg3[%c2, %c0_39, %c0_40] : memref<6x16x49xf32, #tpu.memory_space<vmem>>, vector<1x16x49xf32>
    %113 = vector.shape_cast %112 : vector<1x16x49xf32> to vector<16x49xf32>
    %114 = vector.extract_strided_slice %113 {offsets = [0, 0], sizes = [16, 48], strides = [1, 1]} : vector<16x49xf32> to vector<16x48xf32>
    %115 = vector.extract_strided_slice %113 {offsets = [0, 48], sizes = [16, 1], strides = [1, 1]} : vector<16x49xf32> to vector<16x1xf32>
    %c1_i32_41 = arith.constant 1 : i32
    %116 = tpu.dynamic_rotate %111 by %c1_i32_41 dim 1 : vector<16x32xf32>, i32 -> vector<16x32xf32>
    %cst_42 = arith.constant 0.000000e+00 : f32
    %117 = vector.shape_cast %53 : vector<1x32xi1> to vector<1x32xi1>
    %118 = vector.broadcast %117 : vector<1x32xi1> to vector<16x32xi1>
    %119 = vector.broadcast %cst_42 : f32 to vector<16x32xf32>
    %120 = arith.select %118, %119, %116 : vector<16x32xi1>, vector<16x32xf32>
    %c31_i32_43 = arith.constant 31 : i32
    %121 = tpu.dynamic_rotate %111 by %c31_i32_43 dim 1 : vector<16x32xf32>, i32 -> vector<16x32xf32>
    %cst_44 = arith.constant 0.000000e+00 : f32
    %122 = vector.shape_cast %71 : vector<1x32xi1> to vector<1x32xi1>
    %123 = vector.broadcast %122 : vector<1x32xi1> to vector<16x32xi1>
    %124 = vector.broadcast %cst_44 : f32 to vector<16x32xf32>
    %125 = arith.select %123, %124, %121 : vector<16x32xi1>, vector<16x32xf32>
    %126 = tpu.concatenate %120, %111, %125 in 0 : vector<16x32xf32>, vector<16x32xf32>, vector<16x32xf32> -> vector<48x32xf32>
    %cst_45 = arith.constant dense<0.000000e+00> : vector<16x32xf32>
    %127 = tpu.matmul %114, %126, %cst_45 {dimension_numbers = #tpu.dot_dimension_numbers<[1], [0], [0], [1], [0, 0, 1, 1], [], []>, precision = #tpu.contract_precision<fp32>} : vector<16x48xf32>, vector<48x32xf32>, vector<16x32xf32> -> vector<16x32xf32>
    %128 = vector.broadcast %115 : vector<16x1xf32> to vector<16x32xf32>
    %129 = arith.addf %127, %128 : vector<16x32xf32>
    %cst_46 = arith.constant 0.000000e+00 : f32
    %130 = vector.broadcast %cst_46 : f32 to vector<16x32xf32>
    %131 = arith.maximumf %129, %130 : vector<16x32xf32>
    %132 = arith.addf %131, %91 : vector<16x32xf32>
    %c3 = arith.constant 3 : index
    %c0_47 = arith.constant 0 : index
    %c0_48 = arith.constant 0 : index
    %133 = vector.load %arg3[%c3, %c0_47, %c0_48] : memref<6x16x49xf32, #tpu.memory_space<vmem>>, vector<1x16x49xf32>
    %134 = vector.shape_cast %133 : vector<1x16x49xf32> to vector<16x49xf32>
    %135 = vector.extract_strided_slice %134 {offsets = [0, 0], sizes = [16, 48], strides = [1, 1]} : vector<16x49xf32> to vector<16x48xf32>
    %136 = vector.extract_strided_slice %134 {offsets = [0, 48], sizes = [16, 1], strides = [1, 1]} : vector<16x49xf32> to vector<16x1xf32>
    %c1_i32_49 = arith.constant 1 : i32
    %137 = tpu.dynamic_rotate %132 by %c1_i32_49 dim 1 : vector<16x32xf32>, i32 -> vector<16x32xf32>
    %cst_50 = arith.constant 0.000000e+00 : f32
    %138 = vector.shape_cast %53 : vector<1x32xi1> to vector<1x32xi1>
    %139 = vector.broadcast %138 : vector<1x32xi1> to vector<16x32xi1>
    %140 = vector.broadcast %cst_50 : f32 to vector<16x32xf32>
    %141 = arith.select %139, %140, %137 : vector<16x32xi1>, vector<16x32xf32>
    %c31_i32_51 = arith.constant 31 : i32
    %142 = tpu.dynamic_rotate %132 by %c31_i32_51 dim 1 : vector<16x32xf32>, i32 -> vector<16x32xf32>
    %cst_52 = arith.constant 0.000000e+00 : f32
    %143 = vector.shape_cast %71 : vector<1x32xi1> to vector<1x32xi1>
    %144 = vector.broadcast %143 : vector<1x32xi1> to vector<16x32xi1>
    %145 = vector.broadcast %cst_52 : f32 to vector<16x32xf32>
    %146 = arith.select %144, %145, %142 : vector<16x32xi1>, vector<16x32xf32>
    %147 = tpu.concatenate %141, %132, %146 in 0 : vector<16x32xf32>, vector<16x32xf32>, vector<16x32xf32> -> vector<48x32xf32>
    %cst_53 = arith.constant dense<0.000000e+00> : vector<16x32xf32>
    %148 = tpu.matmul %135, %147, %cst_53 {dimension_numbers = #tpu.dot_dimension_numbers<[1], [0], [0], [1], [0, 0, 1, 1], [], []>, precision = #tpu.contract_precision<fp32>} : vector<16x48xf32>, vector<48x32xf32>, vector<16x32xf32> -> vector<16x32xf32>
    %149 = vector.broadcast %136 : vector<16x1xf32> to vector<16x32xf32>
    %150 = arith.addf %148, %149 : vector<16x32xf32>
    %cst_54 = arith.constant 0.000000e+00 : f32
    %151 = vector.broadcast %cst_54 : f32 to vector<16x32xf32>
    %152 = arith.maximumf %150, %151 : vector<16x32xf32>
    %c4 = arith.constant 4 : index
    %c0_55 = arith.constant 0 : index
    %c0_56 = arith.constant 0 : index
    %153 = vector.load %arg3[%c4, %c0_55, %c0_56] : memref<6x16x49xf32, #tpu.memory_space<vmem>>, vector<1x16x49xf32>
    %154 = vector.shape_cast %153 : vector<1x16x49xf32> to vector<16x49xf32>
    %155 = vector.extract_strided_slice %154 {offsets = [0, 0], sizes = [16, 48], strides = [1, 1]} : vector<16x49xf32> to vector<16x48xf32>
    %156 = vector.extract_strided_slice %154 {offsets = [0, 48], sizes = [16, 1], strides = [1, 1]} : vector<16x49xf32> to vector<16x1xf32>
    %c1_i32_57 = arith.constant 1 : i32
    %157 = tpu.dynamic_rotate %152 by %c1_i32_57 dim 1 : vector<16x32xf32>, i32 -> vector<16x32xf32>
    %cst_58 = arith.constant 0.000000e+00 : f32
    %158 = vector.shape_cast %53 : vector<1x32xi1> to vector<1x32xi1>
    %159 = vector.broadcast %158 : vector<1x32xi1> to vector<16x32xi1>
    %160 = vector.broadcast %cst_58 : f32 to vector<16x32xf32>
    %161 = arith.select %159, %160, %157 : vector<16x32xi1>, vector<16x32xf32>
    %c31_i32_59 = arith.constant 31 : i32
    %162 = tpu.dynamic_rotate %152 by %c31_i32_59 dim 1 : vector<16x32xf32>, i32 -> vector<16x32xf32>
    %cst_60 = arith.constant 0.000000e+00 : f32
    %163 = vector.shape_cast %71 : vector<1x32xi1> to vector<1x32xi1>
    %164 = vector.broadcast %163 : vector<1x32xi1> to vector<16x32xi1>
    %165 = vector.broadcast %cst_60 : f32 to vector<16x32xf32>
    %166 = arith.select %164, %165, %162 : vector<16x32xi1>, vector<16x32xf32>
    %167 = tpu.concatenate %161, %152, %166 in 0 : vector<16x32xf32>, vector<16x32xf32>, vector<16x32xf32> -> vector<48x32xf32>
    %cst_61 = arith.constant dense<0.000000e+00> : vector<16x32xf32>
    %168 = tpu.matmul %155, %167, %cst_61 {dimension_numbers = #tpu.dot_dimension_numbers<[1], [0], [0], [1], [0, 0, 1, 1], [], []>, precision = #tpu.contract_precision<fp32>} : vector<16x48xf32>, vector<48x32xf32>, vector<16x32xf32> -> vector<16x32xf32>
    %169 = vector.broadcast %156 : vector<16x1xf32> to vector<16x32xf32>
    %170 = arith.addf %168, %169 : vector<16x32xf32>
    %cst_62 = arith.constant 0.000000e+00 : f32
    %171 = vector.broadcast %cst_62 : f32 to vector<16x32xf32>
    %172 = arith.maximumf %170, %171 : vector<16x32xf32>
    %173 = arith.addf %172, %132 : vector<16x32xf32>
    %c5 = arith.constant 5 : index
    %c0_63 = arith.constant 0 : index
    %c0_64 = arith.constant 0 : index
    %174 = vector.load %arg3[%c5, %c0_63, %c0_64] : memref<6x16x49xf32, #tpu.memory_space<vmem>>, vector<1x16x49xf32>
    %175 = vector.shape_cast %174 : vector<1x16x49xf32> to vector<16x49xf32>
    %176 = vector.extract_strided_slice %175 {offsets = [0, 0], sizes = [16, 48], strides = [1, 1]} : vector<16x49xf32> to vector<16x48xf32>
    %177 = vector.extract_strided_slice %175 {offsets = [0, 48], sizes = [16, 1], strides = [1, 1]} : vector<16x49xf32> to vector<16x1xf32>
    %c1_i32_65 = arith.constant 1 : i32
    %178 = tpu.dynamic_rotate %173 by %c1_i32_65 dim 1 : vector<16x32xf32>, i32 -> vector<16x32xf32>
    %cst_66 = arith.constant 0.000000e+00 : f32
    %179 = vector.shape_cast %53 : vector<1x32xi1> to vector<1x32xi1>
    %180 = vector.broadcast %179 : vector<1x32xi1> to vector<16x32xi1>
    %181 = vector.broadcast %cst_66 : f32 to vector<16x32xf32>
    %182 = arith.select %180, %181, %178 : vector<16x32xi1>, vector<16x32xf32>
    %c31_i32_67 = arith.constant 31 : i32
    %183 = tpu.dynamic_rotate %173 by %c31_i32_67 dim 1 : vector<16x32xf32>, i32 -> vector<16x32xf32>
    %cst_68 = arith.constant 0.000000e+00 : f32
    %184 = vector.shape_cast %71 : vector<1x32xi1> to vector<1x32xi1>
    %185 = vector.broadcast %184 : vector<1x32xi1> to vector<16x32xi1>
    %186 = vector.broadcast %cst_68 : f32 to vector<16x32xf32>
    %187 = arith.select %185, %186, %183 : vector<16x32xi1>, vector<16x32xf32>
    %188 = tpu.concatenate %182, %173, %187 in 0 : vector<16x32xf32>, vector<16x32xf32>, vector<16x32xf32> -> vector<48x32xf32>
    %cst_69 = arith.constant dense<0.000000e+00> : vector<16x32xf32>
    %189 = tpu.matmul %176, %188, %cst_69 {dimension_numbers = #tpu.dot_dimension_numbers<[1], [0], [0], [1], [0, 0, 1, 1], [], []>, precision = #tpu.contract_precision<fp32>} : vector<16x48xf32>, vector<48x32xf32>, vector<16x32xf32> -> vector<16x32xf32>
    %190 = vector.broadcast %177 : vector<16x1xf32> to vector<16x32xf32>
    %191 = arith.addf %189, %190 : vector<16x32xf32>
    %cst_70 = arith.constant 0.000000e+00 : f32
    %192 = vector.broadcast %cst_70 : f32 to vector<16x32xf32>
    %193 = arith.maximumf %191, %192 : vector<16x32xf32>
    %c0_71 = arith.constant 0 : index
    %c0_72 = arith.constant 0 : index
    %c0_73 = arith.constant 0 : index
    %194 = vector.load %arg4[%c0_71, %c0_72, %c0_73] : memref<1x16x32xf32, #tpu.memory_space<vmem>>, vector<1x16x32xf32>
    %195 = vector.shape_cast %194 : vector<1x16x32xf32> to vector<16x32xf32>
    %196 = vector.shape_cast %193 : vector<16x32xf32> to vector<1x16x32xf32>
    tpu.vector_store %arg4[%c0_71, %c0_72, %c0_73], %196 {strides = array<i32>} : memref<1x16x32xf32, #tpu.memory_space<vmem>>, vector<1x16x32xf32>,
    return
  }
  func.func @transform_0(%arg0: i32) -> (i32, i32, i32) {
    %c0_i32 = arith.constant 0 : i32
    %c0_i32_0 = arith.constant 0 : i32
    %c0_i32_1 = arith.constant 0 : i32
    return %arg0, %c0_i32, %c0_i32_0 : i32, i32, i32
  }
  func.func @transform_1(%arg0: i32) -> (i32, i32, i32) {
    %c0_i32 = arith.constant 0 : i32
    %c0_i32_0 = arith.constant 0 : i32
    %c0_i32_1 = arith.constant 0 : i32
    %c0_i32_2 = arith.constant 0 : i32
    return %c0_i32, %c0_i32_0, %c0_i32_1 : i32, i32, i32
  }
  func.func @transform_2(%arg0: i32) -> (i32, i32, i32) {
    %c0_i32 = arith.constant 0 : i32
    %c0_i32_0 = arith.constant 0 : i32
    %c0_i32_1 = arith.constant 0 : i32
    %c0_i32_2 = arith.constant 0 : i32
    return %c0_i32, %c0_i32_0, %c0_i32_1 : i32, i32, i32
  }
  func.func @transform_3(%arg0: i32) -> (i32, i32, i32) {
    %c0_i32 = arith.constant 0 : i32
    %c0_i32_0 = arith.constant 0 : i32
    %c0_i32_1 = arith.constant 0 : i32
    return %arg0, %c0_i32, %c0_i32_0 : i32, i32, i32
  }
}

</mosaic_0001>

<bundles_post_ra>
// kernel: tpu_custom_call.1
= control target key start
LH: loop header
LB: loop body
LE: loop exit
PB: predicated region body
PF: predicated region fallthrough
CT: control target
= control target key end

     0   :  { %8 = vsyncpa [#allocation3], 0  ;;  %s8809_s0 = inlined_call_operand.vmem [shape: f32[2,12,256], index: 0, kind: input, shape index: {}]   ;;  %s8810_s1 = inlined_call_operand.hbm [shape: f32[2,16,17], index: 1, kind: input, shape index: {}]   ;;  %s8811_s2 = inlined_call_operand.vmem [shape: f32[6,16,49], index: 2, kind: input, shape index: {}]   ;;  %s8812_s3 = inlined_call_operand.hbm [shape: f32[1,16,32], index: 3, kind: output, shape index: {}]  }
   0x1   :  { %9 = vsyncpa [#allocation4], 0  ;;  %s7710_s12 = smov [#allocation2]   ;;  %s7662_s16 = scalar_lea.hbm %s8810_s1, 512 }
   0x2   :  { %s17_s13 = sshll.u32 %s7710_s12, 4  ;;  %p7663_p0 = scmp.ne.s32.totalorder %s8810_s1, %s7662_s16  ;;  %s18_s13 = int_to_ptr.vmem [resolvable:$true] %s17_s13 }
   0x3   :  { %p7666_p1 = scmp.lt.u32.totalorder %s7662_s16, %s8810_s1 }
   0x5   :  { %p7668_p2 = pnand %p7666_p1, %p7663_p0 }
   0x7   :  { %7671 = shalt.err (!%p7668_p2)
}
   0x8   :  { %s7672_s21 = scalar_lea.vmem %s18_s13, 512  ;;  %p7677_p4 = scmp.lt.s32.totalorder %s18_s13, %s18_s13 }
   0x9   :  { %p7673_p3 = scmp.ne.s32.totalorder %s18_s13, %s7672_s21  ;;  %p7678_p5 = scmp.lt.s32.totalorder %s7672_s21, %s7672_s21 }
   0xb   :  { %p7679_p6 = por %p7678_p5, %p7677_p4 }
   0xd   :  { %p7680_p7 = pnand %p7679_p6, %p7673_p3 }
   0xf   :  { %7683 = shalt.err (!%p7680_p7)
}
  0x10   :  { %s7711_s22 = smov 128   ;;  %s7712_s23 = smov 8  }
  0x11   :  { %23 = dma.hbm_to_vmem [thread:$0]  %s8810_s1, 512, %s18_s13, [#allocation3], %s7711_s22, %s7711_s22, %s7712_s23  }
  0x12   :  { %7706 = dma.done.wait [#allocation3], 512  }
  0x13   :  { %7707 = vsyncadd [#allocation3], 4294966784  ;;  %v7713_v0 = vmov 0.0   ;;  %v7714_v1 = vmov 16   ;;  %vm58_vm0 = vcmask 1043456   ;;  %v30_v2 = vld [vmem:[%s8809_s0 + $0x8] sm:$0xff] }
  0x14   :  { %139 = vmatprep.mubr.f32.mxu0 %v7713_v0  ;;  %679 = vmatprep.mubr.f32.mxu1 %v7713_v0  ;;  %v32_v3 = vld [vmem:[%s8809_s0 + $0x18] sm:$0xf]  ;;  %v6067_v4 = vld [vmem:[%s8809_s0 + $0x28] sm:$0xff]  ;;  %vm53_vm1 = vcmask 97280   ;;  %v71_v6 = vand.u32 4294901760, %v30_v2  ;;  %v29_v9 = vld [vmem:[%s8809_s0] sm:$0xff] }
  0x15   :  { %7626 = vset.pattern.permute.xlu0 %v7714_v1  ;;  %7627 = vset.pattern.permute.xlu1 %v7714_v1  ;;  %v63_v5 = vsel %vm58_vm0, %v32_v3, 0  ;;  %v6069_v7 = vld [vmem:[%s8809_s0 + $0x38] sm:$0xf]  ;;  %v611_v8 = vand.u32 4294901760, %v6067_v4  ;;  %v31_v12 = vld [vmem:[%s8809_s0 + $0x10] sm:$0xf] }
  0x16   :  { %v75_v10 = vand.u32 4294901760, %v63_v5  ;;  %v69_v11 = vsel %vm58_vm0, %v6069_v7, 0  ;;  %v73_v13 = vand.u32 4294901760, %v29_v9  ;;  %v6066_v14 = vld [vmem:[%s8809_s0 + $0x20] sm:$0xff]  ;;  %v7784_v15 = vsub.f32 %v30_v2, %v71_v6  ;;  %v6068_v19 = vld [vmem:[%s8809_s0 + $0x30] sm:$0xf] }
  0x17   :  { %v615_v16 = vand.u32 4294901760, %v69_v11  ;;  %v7786_v17 = vsub.f32 %v6067_v4, %v611_v8  ;;  %v60_v18 = vsel %vm58_vm0, %v31_v12, 0  ;;  %v38_v20 = vld [vmem:[#allocation2] sm:$0xff]  ;;  %v39_v25 = vld [vmem:[#allocation2 + $0x8] sm:$0xff]  ;;  %v66_v28 = vsel %vm58_vm0, %v6068_v19, 0  ;;  %s7715_s0 = smov 64  }
  0x18   :  { %v7792_v21 = vpack.c.bf16 %v75_v10, %v71_v6  ;;  %v7794_v22 = vsub.f32 %v63_v5, %v75_v10  ;;  %v77_v23 = vand.u32 4294901760, %v60_v18  ;;  %v7796_v24 = vsub.f32 %v29_v9, %v73_v13  ;;  %45 = vperm.xlu0 %7626, %v38_v20   ;;  %s7716_s14 = smov 96   ;;  %s7717_s15 = smov 112  }
  0x19   :  { %v7798_v26 = vpack.c.bf16 %v615_v16, %v611_v8  ;;  %v7800_v27 = vsub.f32 %v69_v11, %v615_v16  ;;  %v613_v29 = vand.u32 4294901760, %v6066_v14  ;;  %v617_v32 = vand.u32 4294901760, %v66_v28  ;;  %s7718_s16 = smov 16   ;;  %s7719_s17 = smov 32  }
  0x1a   :  { %6917 = vmatprep.subr.bf16.mxu0 %v7792_v21  ;;  %v7804_v30 = vpack.c.bf16 %v77_v23, %v73_v13  ;;  %v7806_v31 = vsub.f32 %v60_v18, %v77_v23  ;;  %v54_v33 = vsel %vm53_vm1, %v38_v20, 0  ;;  %v56_v36 = vsel %vm53_vm1, %v39_v25, 0  ;;  %s7720_s18 = smov 97   ;;  %s7721_s21 = smov 127  }
  0x1b   :  { %6941 = vmatprep.subr.bf16.mxu1 %v7798_v26  ;;  %v7810_v34 = vsub.f32 %v6066_v14, %v613_v29  ;;  %v7812_v35 = vand.u32 4294901760, %v54_v33  ;;  %v164_v37 = vand.u32 4294901760, %v7784_v15  ;;  %v7817_v38 = vpack.c.bf16 %v617_v32, %v613_v29 }
  0x1c   :  { %6919 = vmatpush1.bf16.msra.mxu0 %v7804_v30  ;;  %v7819_v39 = vsub.f32 %v66_v28, %v617_v32  ;;  %v7821_v40 = vand.u32 4294901760, %v56_v36  ;;  %v176_v41 = vand.u32 4294901760, %v7794_v22  ;;  %50 = vperm.xlu0 %7626, %v39_v25   ;;  %v704_v44 = vand.u32 4294901760, %v7786_v17 }
  0x1d   :  { %v7825_v42 = vsub.f32 %v54_v33, %v7812_v35  ;;  %v165_v43 = vsub.f32 %v7784_v15, %v164_v37  ;;  %v716_v45 = vand.u32 4294901760, %v7800_v27  ;;  %6943 = vmatpush1.bf16.msra.mxu1 %v7817_v38  ;;  %v170_v48 = vand.u32 4294901760, %v7796_v24 }
  0x1e   :  { %v7834_v46 = vsub.f32 %v56_v36, %v7821_v40  ;;  %v177_v47 = vsub.f32 %v7794_v22, %v176_v41  ;;  %v182_v49 = vand.u32 4294901760, %v7806_v31  ;;  %v705_v52 = vsub.f32 %v7786_v17, %v704_v44 }
  0x1f   :  { %v7842_v50 = vand.u32 4294901760, %v7825_v42  ;;  %v166_v51 = vand.u32 4294901760, %v165_v43  ;;  %v717_v53 = vsub.f32 %v7800_v27, %v716_v45  ;;  %v171_v56 = vsub.f32 %v7796_v24, %v170_v48 }
  0x20   :  { %v7851_v54 = vand.u32 4294901760, %v7834_v46  ;;  %v178_v55 = vand.u32 4294901760, %v177_v47  ;;  %v183_v57 = vsub.f32 %v7806_v31, %v182_v49  ;;  %v706_v59 = vand.u32 4294901760, %v705_v52 }
  0x21   :  { %v143_v58 = vsub.f32 %v7825_v42, %v7842_v50  ;;  %v718_v60 = vand.u32 4294901760, %v717_v53  ;;  %v710_v61 = vand.u32 4294901760, %v7810_v34  ;;  %v172_v1 = vand.u32 4294901760, %v171_v56 }
  0x22   :  { %v154_v62 = vsub.f32 %v7834_v46, %v7851_v54  ;;  %v6920_v63 = vpack.c.bf16 %v178_v55, %v166_v51  ;;  %v184_v2 = vand.u32 4294901760, %v183_v57  ;;  %v722_v6 = vand.u32 4294901760, %v7819_v39 }
  0x23   :  { %v144_v3 = vand.u32 4294901760, %v143_v58  ;;  %v6944_v4 = vpack.c.bf16 %v718_v60, %v706_v59  ;;  %v711_v5 = vsub.f32 %v7810_v34, %v710_v61  ;;  %v6924_v8 = vpack.c.bf16 %v7794_v22, %v7784_v15  ;;  %v42_v22 = vld [vmem:[#allocation2 + $0x18] sm:$0xff] }
  0x24   :  { %6921 = vmatprep.subr.bf16.mxu0 %v6920_v63  ;;  %v6922_v7 = vpack.c.bf16 %v184_v2, %v172_v1  ;;  %v155_v9 = vand.u32 4294901760, %v154_v62  ;;  %v723_v11 = vsub.f32 %v7819_v39, %v722_v6  ;;  %v6948_v13 = vpack.c.bf16 %v7800_v27, %v7786_v17 }
  0x25   :  { %145 = vmatmul.mubr.f32.vlgmr.msra.gmra.mrb[0].mxu0 %v144_v3  ;;  %685 = vmatmul.mubr.f32.vlgmr.msra.gmra.mrb[0].mxu1 %v144_v3  ;;  %v712_v10 = vand.u32 4294901760, %v711_v5  ;;  %v6926_v16 = vpack.c.bf16 %v7806_v31, %v7796_v24  ;;  %v6950_v18 = vpack.c.bf16 %v7819_v39, %v7810_v34  ;;  %v6932_v19 = vpack.c.bf16 %v176_v41, %v164_v37 }
  0x26   :  { %150 = vmatprep.mubr.f32.mxu0 %v7713_v0  ;;  %690 = vmatprep.mubr.f32.mxu1 %v7713_v0  ;;  %v724_v12 = vand.u32 4294901760, %v723_v11  ;;  %v6956_v20 = vpack.c.bf16 %v716_v45, %v704_v44  ;;  %v6934_v15 = vpack.c.bf16 %v182_v49, %v170_v48  ;;  %v6958_v17 = vpack.c.bf16 %v722_v6, %v710_v61 }
  0x27   :  { %6945 = vmatprep.subr.bf16.mxu1 %v6944_v4  ;;  %6923 = vmatpush1.bf16.msra.mxu0 %v6922_v7  ;;  %vm1209_vm2 = vcmask 130048   ;;  %vm2421_vm6 = vcmask 1047808   ;;  %vm2466_vm7 = vcmask 392192   ;;  %vm6046_vm10 = vcmask 261120  }
  0x28   :  { %6925 = vmatprep.subr.bf16.mxu0 %v6924_v8  ;;  %v6946_v14 = vpack.c.bf16 %v724_v12, %v712_v10  ;;  %v1212_v51 = vsel %vm1209_vm2, %v42_v22, 0 }
  0x29   :  { %156 = vmatmul.mubr.f32.gmra.mrb[2].mxu0 %v155_v9  ;;  %696 = vmatmul.mubr.f32.gmra.mrb[2].mxu1 %v155_v9  ;;  %v7943_v59 = vand.u32 4294901760, %v1212_v51 }
  0x2a   :  { %246 = vmatprep.mubr.f32.mxu0 %v7713_v0  ;;  %786 = vmatprep.mubr.f32.mxu1 %v7713_v0 }
  0x2b   :  { %6947 = vmatpush1.bf16.msra.mxu1 %v6946_v14  ;;  %v7949_v6 = vsub.f32 %v1212_v51, %v7943_v59 }
  0x2c   :  { %6949 = vmatprep.subr.bf16.mxu1 %v6948_v13 }
  0x2d   :  { %248 = vmatmul.mubr.f32.vlgmr.msra.gmra.mrb[0].mxu0 %v7812_v35  ;;  %v7955_v9 = vand.u32 4294901760, %v7949_v6 }
  0x2e   :  { %788 = vmatmul.mubr.f32.vlgmr.msra.gmra.mrb[0].mxu1 %v7812_v35  ;;  %253 = vmatprep.mubr.f32.mxu0 %v7713_v0 }
  0x2f   :  { %793 = vmatprep.mubr.f32.mxu1 %v7713_v0  ;;  %6927 = vmatpush1.bf16.msra.mxu0 %v6926_v16 }
  0x30   :  { %6951 = vmatpush1.bf16.msra.mxu1 %v6950_v18  ;;  %6929 = vmatprep.subr.bf16.mxu0 %v7792_v21  ;;  %v1297_v18 = vsub.f32 %v7949_v6, %v7955_v9 }
  0x31   :  { %255 = vmatmul.mubr.f32.gmra.mrb[2].mxu0 %v7821_v40  ;;  %6953 = vmatprep.subr.bf16.mxu1 %v7798_v26 }
  0x32   :  { %795 = vmatmul.mubr.f32.gmra.mrb[2].mxu1 %v7821_v40  ;;  %333 = vmatprep.mubr.f32.mxu0 %v7713_v0 }
  0x33   :  { %873 = vmatprep.mubr.f32.mxu1 %v7713_v0 }
  0x35   :  { %336 = vmatmul.mubr.f32.vlgmr.msra.gmra.mrb[0].mxu0 %v7825_v42 }
  0x36   :  { %876 = vmatmul.mubr.f32.vlgmr.msra.gmra.mrb[0].mxu1 %v7825_v42  ;;  %341 = vmatprep.mubr.f32.mxu0 %v7713_v0 }
  0x37   :  { %881 = vmatprep.mubr.f32.mxu1 %v7713_v0  ;;  %6931 = vmatpush1.bf16.msra.mxu0 %v7804_v30 }
  0x38   :  { %6955 = vmatpush1.bf16.msra.mxu1 %v7817_v38  ;;  %6933 = vmatprep.subr.bf16.mxu0 %v6932_v19 }
  0x39   :  { %344 = vmatmul.mubr.f32.gmra.mrb[2].mxu0 %v7834_v46  ;;  %6957 = vmatprep.subr.bf16.mxu1 %v6956_v20 }
  0x3a   :  { %884 = vmatmul.mubr.f32.gmra.mrb[2].mxu1 %v7834_v46  ;;  %418 = vmatprep.mubr.f32.mxu0 %v7713_v0 }
  0x3b   :  { %958 = vmatprep.mubr.f32.mxu1 %v7713_v0 }
  0x3d   :  { %422 = vmatmul.mubr.f32.vlgmr.msra.gmra.mrb[0].mxu0 %v7842_v50 }
  0x3e   :  { %962 = vmatmul.mubr.f32.vlgmr.msra.gmra.mrb[0].mxu1 %v7842_v50  ;;  %427 = vmatprep.mubr.f32.mxu0 %v7713_v0 }
  0x3f   :  { %967 = vmatprep.mubr.f32.mxu1 %v7713_v0  ;;  %6935 = vmatpush1.bf16.msra.mxu0 %v6934_v15 }
  0x40   :  { %6959 = vmatpush1.bf16.msra.mxu1 %v6958_v17  ;;  %6937 = vmatprep.subr.bf16.mxu0 %v7792_v21  ;;  %v41_v21 = vld [vmem:[#allocation2 + $0x10] sm:$0xff] }
  0x41   :  { %431 = vmatmul.mubr.f32.gmra.mrb[2].mxu0 %v7851_v54  ;;  %6961 = vmatprep.subr.bf16.mxu1 %v7798_v26  ;;  %v1210_v49 = vsel %vm1209_vm2, %v41_v21, 0 }
  0x42   :  { %971 = vmatmul.mubr.f32.gmra.mrb[2].mxu1 %v7851_v54  ;;  %513 = vmatprep.mubr.f32.mxu0 %v7713_v0  ;;  %v7941_v56 = vand.u32 4294901760, %v1210_v49 }
  0x43   :  { %1053 = vmatprep.mubr.f32.mxu1 %v7713_v0  ;;  %1201 = vperm.xlu1 %7627, %v41_v21  }
  0x44   :  { %v7946_v3 = vsub.f32 %v1210_v49, %v7941_v56 }
  0x45   :  { %515 = vmatmul.mubr.f32.vlgmr.msra.gmra.mrb[0].mxu0 %v7812_v35 }
  0x46   :  { %1055 = vmatmul.mubr.f32.vlgmr.msra.gmra.mrb[0].mxu1 %v7812_v35  ;;  %520 = vmatprep.mubr.f32.mxu0 %v7713_v0  ;;  %v7952_v8 = vand.u32 4294901760, %v7946_v3 }
  0x47   :  { %1060 = vmatprep.mubr.f32.mxu1 %v7713_v0  ;;  %6939 = vmatpush1.bf16.msra.mxu0 %v7804_v30 }
  0x48   :  { %6963 = vmatpush1.bf16.msra.mxu1 %v7817_v38  ;;  %1206 = vperm.xlu1 %7627, %v42_v22   ;;  %v1286_v13 = vsub.f32 %v7946_v3, %v7952_v8 }
  0x49   :  { %522 = vmatmul.mubr.f32.gmra.mrb[2].mxu0 %v7821_v40 }
  0x4a   :  { %1062 = vmatmul.mubr.f32.gmra.mrb[2].mxu1 %v7821_v40  ;;  %596 = vmatprep.mubr.f32.mxu0 %v7713_v0 }
  0x4b   :  { %1136 = vmatprep.mubr.f32.mxu1 %v7713_v0 }
  0x4d   :  { %598 = vmatmul.mubr.f32.vlgmr.msra.gmra.mrb[0].mxu0 %v7812_v35 }
  0x4e   :  { %1138 = vmatmul.mubr.f32.vlgmr.msra.gmra.mrb[0].mxu1 %v7812_v35  ;;  %603 = vmatprep.mubr.f32.mxu0 %v7713_v0 }
  0x4f   :  { %1143 = vmatprep.mubr.f32.mxu1 %v7713_v0 }
  0x51   :  { %605 = vmatmul.mubr.f32.gmra.mrb[2].mxu0 %v7821_v40 }
  0x52   :  { %1145 = vmatmul.mubr.f32.gmra.mrb[2].mxu1 %v7821_v40  ;;  %1282 = vmatprep.mubr.f32.mxu0 %v7713_v0 }
  0x53   :  { %1822 = vmatprep.mubr.f32.mxu1 %v7713_v0 }
  0x97   :  { %v46_v23 = vpop.permute.xlu0 %45 }
  0x9b   :  { %v51_v34 = vpop.permute.xlu0 %50 }
 0x120   :  { %v599_v24 = vpop.f32.mrb[0].mxu0 }
 0x121   :  { %v7444_v25 = vadd.f32 %v599_v24, %v46_v23  ;;  %v1139_v26 = vpop.f32.mrb[0].mxu1  ;;  %v601_v27 = vpop.f32.mrb[1].mxu0 }
 0x122   :  { %v7448_v28 = vadd.f32 %v1139_v26, %v46_v23  ;;  %v7445_v29 = vadd.f32 %v601_v27, %v46_v23  ;;  %v1141_v30 = vpop.f32.mrb[1].mxu1  ;;  %v1287_v26 = vand.u32 4294901760, %v1286_v13 }
 0x123   :  { %v6070_v31 = vmul.f32 -1.442695, %v7444_v25  ;;  %v7449_v32 = vadd.f32 %v1141_v30, %v46_v23 }
 0x124   :  { %v6072_v33 = vmul.f32 -1.442695, %v7448_v28  ;;  %v6071_v35 = vmul.f32 -1.442695, %v7445_v29  ;;  %v606_v36 = vpop.f32.mrb[2].mxu0 }
 0x125   :  { %7630 = vpow2.f32 %v6070_v31  ;;  %v6073_v37 = vmul.f32 -1.442695, %v7449_v32  ;;  %v7446_v38 = vadd.f32 %v606_v36, %v51_v34  ;;  %v1146_v39 = vpop.f32.mrb[2].mxu1  ;;  %v608_v40 = vpop.f32.mrb[3].mxu0  ;;  %v1298_v31 = vand.u32 4294901760, %v1297_v18 }
 0x126   :  { %7632 = vpow2.f32 %v6072_v33  ;;  %v7450_v41 = vadd.f32 %v1146_v39, %v51_v34  ;;  %v7447_v42 = vadd.f32 %v608_v40, %v51_v34  ;;  %v1148_v43 = vpop.f32.mrb[3].mxu1 }
 0x127   :  { %7634 = vpow2.f32 %v6071_v35  ;;  %v6074_v44 = vmul.f32 -1.442695, %v7446_v38  ;;  %v7451_v45 = vadd.f32 %v1148_v43, %v51_v34 }
 0x128   :  { %7636 = vpow2.f32 %v6073_v37  ;;  %v6076_v46 = vmul.f32 -1.442695, %v7450_v41  ;;  %v6075_v47 = vmul.f32 -1.442695, %v7447_v42 }
 0x129   :  { %7638 = vpow2.f32 %v6074_v44  ;;  %v6077_v48 = vmul.f32 -1.442695, %v7451_v45 }
 0x12a   :  { %7640 = vpow2.f32 %v6076_v46 }
 0x12b   :  { %7642 = vpow2.f32 %v6075_v47 }
 0x12c   :  { %7644 = vpow2.f32 %v6077_v48 }
 0x12f   :  { %v7631_v50 = vpop.eup %7630 }
 0x130   :  { %v7633_v52 = vpop.eup %7632  ;;  %v1175_v53 = vadd.f32 1.0, %v7631_v50 }
 0x131   :  { %v7635_v54 = vpop.eup %7634  ;;  %v1177_v55 = vadd.f32 1.0, %v7633_v52 }
 0x132   :  { %v7637_v57 = vpop.eup %7636  ;;  %7646 = vrcp.f32 %v1175_v53  ;;  %v1176_v58 = vadd.f32 1.0, %v7635_v54 }
 0x133   :  { %v7639_v60 = vpop.eup %7638  ;;  %7648 = vrcp.f32 %v1177_v55  ;;  %v1178_v61 = vadd.f32 1.0, %v7637_v57 }
 0x134   :  { %v7641_v62 = vpop.eup %7640  ;;  %7650 = vrcp.f32 %v1176_v58  ;;  %v1179_v63 = vadd.f32 1.0, %v7639_v60 }
 0x135   :  { %v7643_v1 = vpop.eup %7642  ;;  %7652 = vrcp.f32 %v1178_v61  ;;  %v1181_v2 = vadd.f32 1.0, %v7641_v62 }
 0x136   :  { %v7645_v4 = vpop.eup %7644  ;;  %7654 = vrcp.f32 %v1179_v63  ;;  %v1180_v5 = vadd.f32 1.0, %v7643_v1 }
 0x137   :  { %7656 = vrcp.f32 %v1181_v2  ;;  %v1182_v7 = vadd.f32 1.0, %v7645_v4 }
 0x138   :  { %7658 = vrcp.f32 %v1180_v5 }
 0x139   :  { %7660 = vrcp.f32 %v1182_v7 }
 0x13c   :  { %v7647_v10 = vpop.eup %7646 }
 0x13d   :  { %v7649_v11 = vpop.eup %7648  ;;  %v1216_v12 = vand.u32 4294901760, %v7647_v10 }
 0x13e   :  { %v7651_v14 = vpop.eup %7650  ;;  %v1756_v16 = vand.u32 4294901760, %v7649_v11 }
 0x13f   :  { %v7653_v19 = vpop.eup %7652  ;;  %v1214_v20 = vand.u32 4294901760, %v7651_v14  ;;  %v7961_v15 = vsub.f32 %v7647_v10, %v1216_v12 }
 0x140   :  { %v7655_v17 = vpop.eup %7654  ;;  %v1754_v21 = vand.u32 4294901760, %v7653_v19  ;;  %v7963_v22 = vsub.f32 %v7649_v11, %v1756_v16 }
 0x141   :  { %v7657_v23 = vpop.eup %7656  ;;  %v7965_v24 = vsub.f32 %v7651_v14, %v1214_v20  ;;  %v1220_v25 = vand.u32 4294901760, %v7655_v17  ;;  %v1313_v27 = vand.u32 4294901760, %v7961_v15 }
 0x142   :  { %v7659_v28 = vpop.eup %7658  ;;  %v7968_v29 = vsub.f32 %v7653_v19, %v1754_v21  ;;  %v1760_v30 = vand.u32 4294901760, %v7657_v23  ;;  %v1853_v32 = vand.u32 4294901760, %v7963_v22 }
 0x143   :  { %v7661_v33 = vpop.eup %7660  ;;  %v1218_v34 = vand.u32 4294901760, %v7659_v28  ;;  %v7971_v35 = vpack.c.bf16 %v1220_v25, %v1216_v12  ;;  %v1324_v36 = vsub.f32 %v7655_v17, %v1220_v25  ;;  %v1307_v37 = vand.u32 4294901760, %v7965_v24 }
 0x144   :  { %v1758_v38 = vand.u32 4294901760, %v7661_v33  ;;  %v7974_v39 = vpack.c.bf16 %v1760_v30, %v1756_v16  ;;  %v1864_v40 = vsub.f32 %v7657_v23, %v1760_v30  ;;  %v1847_v41 = vand.u32 4294901760, %v7968_v29 }
 0x145   :  { %v7977_v42 = vpack.c.bf16 %v1218_v34, %v1214_v20  ;;  %v1318_v43 = vsub.f32 %v7659_v28, %v1218_v34  ;;  %v1308_v44 = vsub.f32 %v7965_v24, %v1307_v37  ;;  %v1314_v45 = vsub.f32 %v7961_v15, %v1313_v27 }
 0x146   :  { %v7981_v46 = vpack.c.bf16 %v1758_v38, %v1754_v21  ;;  %v1858_v47 = vsub.f32 %v7661_v33, %v1758_v38  ;;  %v1848_v48 = vsub.f32 %v7968_v29, %v1847_v41  ;;  %v1325_v49 = vand.u32 4294901760, %v1324_v36 }
 0x147   :  { %6965 = vmatprep.subr.bf16.mxu0 %v7977_v42  ;;  %v1309_v50 = vand.u32 4294901760, %v1308_v44  ;;  %v1319_v51 = vand.u32 4294901760, %v1318_v43  ;;  %v1315_v52 = vand.u32 4294901760, %v1314_v45  ;;  %v1854_v53 = vsub.f32 %v7963_v22, %v1853_v32 }
 0x148   :  { %6989 = vmatprep.subr.bf16.mxu1 %v7981_v46  ;;  %6967 = vmatpush1.bf16.msra.mxu0 %v7971_v35  ;;  %v1849_v54 = vand.u32 4294901760, %v1848_v48  ;;  %v1859_v55 = vand.u32 4294901760, %v1858_v47  ;;  %v1326_v57 = vsub.f32 %v1324_v36, %v1325_v49  ;;  %v1865_v58 = vand.u32 4294901760, %v1864_v40 }
 0x149   :  { %6991 = vmatpush1.bf16.msra.mxu1 %v7974_v39  ;;  %v1320_v60 = vsub.f32 %v1318_v43, %v1319_v51  ;;  %v1855_v61 = vand.u32 4294901760, %v1854_v53  ;;  %v6972_v62 = vpack.c.bf16 %v1318_v43, %v7965_v24  ;;  %v6996_v63 = vpack.c.bf16 %v1858_v47, %v7968_v29 }
 0x14a   :  { %v1860_v1 = vsub.f32 %v1858_v47, %v1859_v55  ;;  %v1327_v2 = vand.u32 4294901760, %v1326_v57  ;;  %v1866_v4 = vsub.f32 %v1864_v40, %v1865_v58  ;;  %v6974_v5 = vpack.c.bf16 %v1324_v36, %v7961_v15 }
 0x14b   :  { %1288 = vmatmul.mubr.f32.vlgmr.msra.gmra.mrb[4].mxu0 %v1287_v26  ;;  %v1321_v7 = vand.u32 4294901760, %v1320_v60  ;;  %v6998_v10 = vpack.c.bf16 %v1864_v40, %v7963_v22  ;;  %v6980_v11 = vpack.c.bf16 %v1319_v51, %v1307_v37  ;;  %v7004_v12 = vpack.c.bf16 %v1859_v55, %v1847_v41 }
 0x14c   :  { %1828 = vmatmul.mubr.f32.vlgmr.msra.gmra.mrb[4].mxu1 %v1287_v26  ;;  %1293 = vmatprep.mubr.f32.mxu0 %v7713_v0  ;;  %v1861_v13 = vand.u32 4294901760, %v1860_v1  ;;  %v6970_v14 = vpack.c.bf16 %v1327_v2, %v1315_v52  ;;  %v1867_v16 = vand.u32 4294901760, %v1866_v4  ;;  %v6982_v18 = vpack.c.bf16 %v1325_v49, %v1313_v27 }
 0x14d   :  { %1833 = vmatprep.mubr.f32.mxu1 %v7713_v0  ;;  %v6968_v19 = vpack.c.bf16 %v1321_v7, %v1309_v50  ;;  %v7006_v20 = vpack.c.bf16 %v1865_v58, %v1853_v32  ;;  %v2318_v40 = vlaneseq }
 0x14e   :  { %v6992_v17 = vpack.c.bf16 %v1861_v13, %v1849_v54  ;;  %v6994_v21 = vpack.c.bf16 %v1867_v16, %v1855_v61 }
 0x14f   :  { %1299 = vmatmul.mubr.f32.gmra.mrb[6].mxu0 %v1298_v31  ;;  %6969 = vmatprep.subr.bf16.mxu0 %v6968_v19  ;;  %v8043_v41 = vand.u32 127, %v2318_v40 }
 0x150   :  { %1839 = vmatmul.mubr.f32.gmra.mrb[6].mxu1 %v1298_v31  ;;  %6993 = vmatprep.subr.bf16.mxu1 %v6992_v17 }
 0x151   :  { %6971 = vmatpush1.bf16.msra.mxu0 %v6970_v14  ;;  %6995 = vmatpush1.bf16.msra.mxu1 %v6994_v21  ;;  %vm2320_vm3 = vcmp.lt.s32.totalorder %v8043_v41, 64  ;;  %vm2353_vm4 = vcmp.lt.s32.totalorder %v8043_v41, 96  ;;  %vm2386_vm5 = vcmp.lt.s32.totalorder %v8043_v41, 112 }
 0x152   :  { %6973 = vmatprep.subr.bf16.mxu0 %v6972_v62  ;;  %6997 = vmatprep.subr.bf16.mxu1 %v6996_v63 }
 0x153   :  { %1389 = vmatprep.mubr.f32.mxu0 %v7713_v0  ;;  %1929 = vmatprep.mubr.f32.mxu1 %v7713_v0 }
 0x154   :  { %1391 = vmatmul.mubr.f32.vlgmr.msra.gmra.mrb[4].mxu0 %v7941_v56  ;;  %1931 = vmatmul.mubr.f32.vlgmr.msra.gmra.mrb[4].mxu1 %v7941_v56 }
 0x155   :  { %6975 = vmatpush1.bf16.msra.mxu0 %v6974_v5  ;;  %6999 = vmatpush1.bf16.msra.mxu1 %v6998_v10 }
 0x156   :  { %6977 = vmatprep.subr.bf16.mxu0 %v7977_v42  ;;  %7001 = vmatprep.subr.bf16.mxu1 %v7981_v46 }
 0x157   :  { %1396 = vmatprep.mubr.f32.mxu0 %v7713_v0  ;;  %1936 = vmatprep.mubr.f32.mxu1 %v7713_v0 }
 0x158   :  { %1398 = vmatmul.mubr.f32.gmra.mrb[6].mxu0 %v7943_v59  ;;  %1938 = vmatmul.mubr.f32.gmra.mrb[6].mxu1 %v7943_v59 }
 0x159   :  { %1476 = vmatprep.mubr.f32.mxu0 %v7713_v0  ;;  %2016 = vmatprep.mubr.f32.mxu1 %v7713_v0 }
 0x15c   :  { %1479 = vmatmul.mubr.f32.vlgmr.msra.gmra.mrb[4].mxu0 %v7946_v3  ;;  %2019 = vmatmul.mubr.f32.vlgmr.msra.gmra.mrb[4].mxu1 %v7946_v3  ;;  %v1202_v3 = vpop.permute.xlu1 %1201 }
 0x15d   :  { %6979 = vmatpush1.bf16.msra.mxu0 %v7971_v35  ;;  %7003 = vmatpush1.bf16.msra.mxu1 %v7974_v39 }
 0x15e   :  { %6981 = vmatprep.subr.bf16.mxu0 %v6980_v11  ;;  %7005 = vmatprep.subr.bf16.mxu1 %v7004_v12 }
 0x15f   :  { %1484 = vmatprep.mubr.f32.mxu0 %v7713_v0  ;;  %2024 = vmatprep.mubr.f32.mxu1 %v7713_v0 }
 0x160   :  { %1487 = vmatmul.mubr.f32.gmra.mrb[6].mxu0 %v7949_v6  ;;  %2027 = vmatmul.mubr.f32.gmra.mrb[6].mxu1 %v7949_v6  ;;  %v1207_v26 = vpop.permute.xlu1 %1206 }
 0x161   :  { %1561 = vmatprep.mubr.f32.mxu0 %v7713_v0  ;;  %2101 = vmatprep.mubr.f32.mxu1 %v7713_v0 }
 0x164   :  { %1565 = vmatmul.mubr.f32.vlgmr.msra.gmra.mrb[4].mxu0 %v7952_v8  ;;  %2105 = vmatmul.mubr.f32.vlgmr.msra.gmra.mrb[4].mxu1 %v7952_v8 }
 0x165   :  { %6983 = vmatpush1.bf16.msra.mxu0 %v6982_v18  ;;  %7007 = vmatpush1.bf16.msra.mxu1 %v7006_v20 }
 0x166   :  { %6985 = vmatprep.subr.bf16.mxu0 %v7977_v42  ;;  %7009 = vmatprep.subr.bf16.mxu1 %v7981_v46 }
 0x167   :  { %1570 = vmatprep.mubr.f32.mxu0 %v7713_v0  ;;  %2110 = vmatprep.mubr.f32.mxu1 %v7713_v0 }
 0x168   :  { %1574 = vmatmul.mubr.f32.gmra.mrb[6].mxu0 %v7955_v9  ;;  %2114 = vmatmul.mubr.f32.gmra.mrb[6].mxu1 %v7955_v9 }
 0x169   :  { %1656 = vmatprep.mubr.f32.mxu0 %v7713_v0  ;;  %2196 = vmatprep.mubr.f32.mxu1 %v7713_v0 }
 0x16c   :  { %1658 = vmatmul.mubr.f32.vlgmr.msra.gmra.mrb[4].mxu0 %v7941_v56  ;;  %2198 = vmatmul.mubr.f32.vlgmr.msra.gmra.mrb[4].mxu1 %v7941_v56 }
 0x16d   :  { %6987 = vmatpush1.bf16.msra.mxu0 %v7971_v35  ;;  %7011 = vmatpush1.bf16.msra.mxu1 %v7974_v39 }
 0x16e   :  { %1663 = vmatprep.mubr.f32.mxu0 %v7713_v0  ;;  %2203 = vmatprep.mubr.f32.mxu1 %v7713_v0 }
 0x170   :  { %1665 = vmatmul.mubr.f32.gmra.mrb[6].mxu0 %v7943_v59  ;;  %2205 = vmatmul.mubr.f32.gmra.mrb[6].mxu1 %v7943_v59 }
 0x171   :  { %1739 = vmatprep.mubr.f32.mxu0 %v7713_v0  ;;  %2279 = vmatprep.mubr.f32.mxu1 %v7713_v0 }
 0x174   :  { %1741 = vmatmul.mubr.f32.vlgmr.msra.gmra.mrb[4].mxu0 %v7941_v56  ;;  %2281 = vmatmul.mubr.f32.vlgmr.msra.gmra.mrb[4].mxu1 %v7941_v56 }
 0x175   :  { %1746 = vmatprep.mubr.f32.mxu0 %v7713_v0  ;;  %2286 = vmatprep.mubr.f32.mxu1 %v7713_v0 }
 0x178   :  { %1748 = vmatmul.mubr.f32.gmra.mrb[6].mxu0 %v7943_v59  ;;  %2288 = vmatmul.mubr.f32.gmra.mrb[6].mxu1 %v7943_v59 }
 0x247   :  { %v1742_v6 = vpop.f32.mrb[4].mxu0  ;;  %v2282_v8 = vpop.f32.mrb[4].mxu1 }
 0x248   :  { %v7452_v9 = vadd.f32 %v1742_v6, %v1202_v3  ;;  %v7456_v15 = vadd.f32 %v2282_v8, %v1202_v3  ;;  %v1744_v22 = vpop.f32.mrb[5].mxu0  ;;  %v2284_v23 = vpop.f32.mrb[5].mxu1 }
 0x249   :  { %v7453_v24 = vadd.f32 %v1744_v22, %v1202_v3  ;;  %v7457_v25 = vadd.f32 %v2284_v23, %v1202_v3 }
 0x24b   :  { %v2294_v27 = vmax.f32 %v7452_v9, %v7453_v24  ;;  %v2295_v56 = vmax.f32 %v7453_v24, %v7456_v15  ;;  %v2296_v28 = vmax.f32 %v7456_v15, %v7457_v25  ;;  %v2297_v29 = vmax.f32 %v7457_v25, %v7452_v9  ;;  %v1749_v30 = vpop.f32.mrb[6].mxu0  ;;  %v2289_v0 = vpop.f32.mrb[6].mxu1 }
 0x24c   :  { %v7454_v31 = vadd.f32 %v1749_v30, %v1207_v26  ;;  %v7458_v32 = vadd.f32 %v2289_v0, %v1207_v26  ;;  %v1751_v33 = vpop.f32.mrb[7].mxu0  ;;  %v2291_v59 = vpop.f32.mrb[7].mxu1 }
 0x24d   :  { %v7455_v34 = vadd.f32 %v1751_v33, %v1207_v26  ;;  %v7459_v35 = vadd.f32 %v2291_v59, %v1207_v26  ;;  %2302 = vrot.lane.b32.xlu0 %v2294_v27, %s7715_s0 }
 0x24f   :  { %v2298_v36 = vmax.f32 %v7454_v31, %v7455_v34  ;;  %v2299_v37 = vmax.f32 %v7455_v34, %v7458_v32  ;;  %v2300_v38 = vmax.f32 %v7458_v32, %v7459_v35  ;;  %v2301_v39 = vmax.f32 %v7459_v35, %v7454_v31 }
 0x251   :  { %2304 = vrot.lane.b32.xlu1 %v2298_v36, %s7715_s0  ;;  %2306 = vrot.lane.b32.xlu0 %v2295_v56, %s7715_s0 }
 0x255   :  { %2308 = vrot.lane.b32.xlu1 %v2299_v37, %s7715_s0  ;;  %2310 = vrot.lane.b32.xlu0 %v2296_v28, %s7715_s0 }
 0x259   :  { %2312 = vrot.lane.b32.xlu1 %v2300_v38, %s7715_s0  ;;  %2314 = vrot.lane.b32.xlu0 %v2297_v29, %s7715_s0 }
 0x25d   :  { %2316 = vrot.lane.b32.xlu1 %v2301_v39, %s7715_s0 }
 0x2bf   :  { %v2303_v42 = vpop.permute.xlu0 %2302 }
 0x2c3   :  { %v2305_v43 = vpop.permute.xlu1 %2304  ;;  %v2307_v44 = vpop.permute.xlu0 %2306 }
 0x2c4   :  { %v2325_v45 = vsel %vm2320_vm3, %v2303_v42, %v2307_v44 }
 0x2c5   :  { %v2329_v46 = vmax.f32 %v2294_v27, %v2325_v45 }
 0x2c7   :  { %v2309_v47 = vpop.permute.xlu1 %2308  ;;  %2337 = vrot.lane.b32.xlu0 %v2329_v46, %s7716_s14  ;;  %v2311_v48 = vpop.permute.xlu0 %2310 }
 0x2c8   :  { %v2326_v49 = vsel %vm2320_vm3, %v2305_v43, %v2309_v47  ;;  %v2323_v62 = vsel %vm2320_vm3, %v2307_v44, %v2311_v48 }
 0x2c9   :  { %v2333_v50 = vmax.f32 %v2298_v36, %v2326_v49  ;;  %v2330_v1 = vmax.f32 %v2295_v56, %v2323_v62 }
 0x2cb   :  { %2339 = vrot.lane.b32.xlu1 %v2333_v50, %s7716_s14  ;;  %v2313_v51 = vpop.permute.xlu1 %2312  ;;  %v2315_v52 = vpop.permute.xlu0 %2314 }
 0x2cc   :  { %v2321_v53 = vsel %vm2320_vm3, %v2311_v48, %v2315_v52  ;;  %v2327_v55 = vsel %vm2320_vm3, %v2315_v52, %v2303_v42  ;;  %v2324_v4 = vsel %vm2320_vm3, %v2309_v47, %v2313_v51 }
 0x2cd   :  { %v2331_v54 = vmax.f32 %v2296_v28, %v2321_v53  ;;  %v2332_v60 = vmax.f32 %v2297_v29, %v2327_v55  ;;  %v2334_v5 = vmax.f32 %v2299_v37, %v2324_v4  ;;  %v2419_v53 = vld [vmem:[%s8811_s2] sm:$0xff]  ;;  %v2409_v4 = vand.u32 15, %v8043_v41 }
 0x2cf   :  { %v2317_v57 = vpop.permute.xlu1 %2316  ;;  %2345 = vrot.lane.b32.xlu0 %v2331_v54, %s7716_s14  ;;  %vm8124_vm8 = vcmp.eq.s32.totalorder %v2409_v4, 0  ;;  %vm8131_vm9 = vcmp.eq.s32.totalorder %v2409_v4, 15 }
 0x2d0   :  { %v2322_v58 = vsel %vm2320_vm3, %v2313_v51, %v2317_v57  ;;  %v2328_v63 = vsel %vm2320_vm3, %v2317_v57, %v2305_v43 }
 0x2d1   :  { %v2335_v61 = vmax.f32 %v2300_v38, %v2322_v58  ;;  %v2336_v2 = vmax.f32 %v2301_v39, %v2328_v63 }
 0x2d3   :  { %2347 = vrot.lane.b32.xlu1 %v2335_v61, %s7716_s14  ;;  %2349 = vrot.lane.b32.xlu0 %v2332_v60, %s7716_s14 }
 0x2d7   :  { %2351 = vrot.lane.b32.xlu1 %v2336_v2, %s7716_s14  ;;  %2341 = vrot.lane.b32.xlu0 %v2330_v1, %s7716_s14 }
 0x2db   :  { %2343 = vrot.lane.b32.xlu1 %v2334_v5, %s7716_s14 }
 0x339   :  { %v2338_v7 = vpop.permute.xlu0 %2337 }
 0x33d   :  { %v2340_v10 = vpop.permute.xlu1 %2339 }
 0x341   :  { %v2346_v11 = vpop.permute.xlu0 %2345 }
 0x345   :  { %v2348_v12 = vpop.permute.xlu1 %2347  ;;  %v2350_v13 = vpop.permute.xlu0 %2349 }
 0x346   :  { %v2354_v14 = vsel %vm2353_vm4, %v2346_v11, %v2350_v13  ;;  %v2360_v18 = vsel %vm2353_vm4, %v2350_v13, %v2338_v7 }
 0x347   :  { %v2364_v16 = vmax.f32 %v2331_v54, %v2354_v14  ;;  %v2365_v21 = vmax.f32 %v2332_v60, %v2360_v18  ;;  %v2467_v54 = vsel %vm2466_vm7, %v2419_v53, 0 }
 0x348   :  { %v8107_v57 = vand.u32 4294901760, %v2467_v54 }
 0x349   :  { %v2352_v19 = vpop.permute.xlu1 %2351  ;;  %2378 = vrot.lane.b32.xlu0 %v2364_v16, %s7717_s15  ;;  %v2342_v20 = vpop.permute.xlu0 %2341 }
 0x34a   :  { %v2355_v17 = vsel %vm2353_vm4, %v2348_v12, %v2352_v19  ;;  %v2361_v6 = vsel %vm2353_vm4, %v2352_v19, %v2340_v10  ;;  %v2358_v8 = vsel %vm2353_vm4, %v2338_v7, %v2342_v20  ;;  %v2356_v23 = vsel %vm2353_vm4, %v2342_v20, %v2346_v11 }
 0x34b   :  { %v2368_v3 = vmax.f32 %v2335_v61, %v2355_v17  ;;  %v2369_v15 = vmax.f32 %v2336_v2, %v2361_v6  ;;  %v2362_v22 = vmax.f32 %v2329_v46, %v2358_v8  ;;  %v2363_v25 = vmax.f32 %v2330_v1, %v2356_v23  ;;  %v2420_v1 = vld [vmem:[%s8811_s2 + $0x8] sm:$0xff] }
 0x34c   :  { %v8113_v60 = vsub.f32 %v2467_v54, %v8107_v57  ;;  %v7722_v2 = vmov 48   ;;  %v2469_v7 = vsel %vm2466_vm7, %v2420_v1, 0 }
 0x34d   :  { %2380 = vrot.lane.b32.xlu1 %v2368_v3, %s7717_s15  ;;  %v2344_v9 = vpop.permute.xlu1 %2343  ;;  %2382 = vrot.lane.b32.xlu0 %v2365_v21, %s7717_s15 }
 0x34e   :  { %v2359_v24 = vsel %vm2353_vm4, %v2340_v10, %v2344_v9  ;;  %v2357_v27 = vsel %vm2353_vm4, %v2344_v9, %v2348_v12  ;;  %v2544_v61 = vand.u32 4294901760, %v8113_v60  ;;  %7629 = vset.pattern.permute.xlu1 %v7722_v2  ;;  %7628 = vset.pattern.permute.xlu0 %v7722_v2 }
 0x34f   :  { %v2366_v26 = vmax.f32 %v2333_v50, %v2359_v24  ;;  %v2367_v56 = vmax.f32 %v2334_v5, %v2357_v27 }
 0x350   :  { %v2545_v62 = vsub.f32 %v8113_v60, %v2544_v61 }
 0x351   :  { %2384 = vrot.lane.b32.xlu1 %v2369_v15, %s7717_s15  ;;  %2370 = vrot.lane.b32.xlu0 %v2362_v22, %s7717_s15 }
 0x352   :  { %v2546_v63 = vand.u32 4294901760, %v2545_v62 }
 0x354   :  { %6388 = vmatprep.mubr.f32.mxu0 %v2546_v63 }
 0x355   :  { %2372 = vrot.lane.b32.xlu1 %v2366_v26, %s7717_s15  ;;  %2374 = vrot.lane.b32.xlu0 %v2363_v25, %s7717_s15 }
 0x359   :  { %2376 = vrot.lane.b32.xlu1 %v2367_v56, %s7717_s15 }
 0x3bb   :  { %v2379_v28 = vpop.permute.xlu0 %2378 }
 0x3bf   :  { %v2381_v29 = vpop.permute.xlu1 %2380  ;;  %v2383_v30 = vpop.permute.xlu0 %2382 }
 0x3c0   :  { %v2387_v0 = vsel %vm2386_vm5, %v2379_v28, %v2383_v30 }
 0x3c1   :  { %v2392_v31 = vmax.f32 %v2364_v16, %v2387_v0  ;;  %v8135_v16 = vand.u32 4294901760, %v2469_v7 }
 0x3c3   :  { %v2385_v32 = vpop.permute.xlu1 %2384  ;;  %2397 = vrot.lane.b32.xlu0 %v2392_v31, %s7718_s16  ;;  %v2371_v34 = vpop.permute.xlu0 %2370  ;;  %v8147_v8 = vsub.f32 %v2469_v7, %v8135_v16 }
 0x3c4   :  { %v2388_v33 = vsel %vm2386_vm5, %v2381_v29, %v2385_v32 }
 0x3c5   :  { %v2394_v59 = vmax.f32 %v2368_v3, %v2388_v33  ;;  %v2554_v30 = vand.u32 4294901760, %v8147_v8 }
 0x3c7   :  { %2399 = vrot.lane.b32.xlu1 %v2394_v59, %s7718_s16  ;;  %v2373_v35 = vpop.permute.xlu1 %2372  ;;  %v2375_v36 = vpop.permute.xlu0 %2374 }
 0x3c8   :  { %v2389_v37 = vsel %vm2386_vm5, %v2371_v34, %v2375_v36 }
 0x3c9   :  { %v2391_v39 = vmax.f32 %v2362_v22, %v2389_v37 }
 0x3cb   :  { %v2377_v38 = vpop.permute.xlu1 %2376 }
 0x3cc   :  { %v2390_v40 = vsel %vm2386_vm5, %v2373_v35, %v2377_v38  ;;  %v2555_v38 = vsub.f32 %v8147_v8, %v2554_v30 }
 0x3cd   :  { %v2393_v44 = vmax.f32 %v2366_v26, %v2390_v40 }
 0x435   :  { %v2398_v42 = vpop.permute.xlu0 %2397 }
 0x436   :  { %v8089_v43 = vsel %vm1209_vm2, %v2391_v39, %v2398_v42 }
 0x437   :  { %2422 = vrot.lane.b32.xlu0 %v8089_v43, %s7719_s17  ;;  %v2478_v41 = vand.u32 4294901760, %v8089_v43 }
 0x439   :  { %v2400_v45 = vpop.permute.xlu1 %2399  ;;  %v8150_v9 = vsub.f32 %v8089_v43, %v2478_v41 }
 0x43a   :  { %v2404_v46 = vsel %vm1209_vm2, %v2393_v44, %v2400_v45  ;;  %v2556_v45 = vand.u32 4294901760, %v2555_v38 }
 0x43b   :  { %2425 = vrot.lane.b32.xlu1 %v2404_v46, %s7719_s17  ;;  %v2481_v11 = vand.u32 4294901760, %v2404_v46  ;;  %v2579_v0 = vand.u32 4294901760, %v8150_v9 }
 0x43d   :  { %v8140_v17 = vsub.f32 %v2404_v46, %v2481_v11  ;;  %v8160_v56 = vpack.c.bf16 %v2481_v11, %v2478_v41  ;;  %v2580_v42 = vsub.f32 %v8150_v9, %v2579_v0  ;;  %v6078_v41 = vld [vmem:[%s8811_s2 + $0x10] sm:$0xff] }
 0x43f   :  { %v2586_v27 = vand.u32 4294901760, %v8140_v17  ;;  %v7040_v54 = vpack.c.bf16 %v8140_v17, %v8150_v9  ;;  %v6079_v9 = vld [vmem:[%s8811_s2 + $0x18] sm:$0xff] }
 0x441   :  { %v2587_v34 = vsub.f32 %v8140_v17, %v2586_v27  ;;  %v7064_v62 = vpack.c.bf16 %v2586_v27, %v2579_v0 }
 0x4a9   :  { %v2423_v47 = vpop.permute.xlu0 %2422 }
 0x4aa   :  { %v2424_v48 = vsel %vm2421_vm6, %v2423_v47, %v8089_v43 }
 0x4ab   :  { %2428 = vrot.lane.b32.xlu0 %v2424_v48, %s7719_s17  ;;  %v2581_v48 = vand.u32 4294901760, %v2580_v42 }
 0x4ad   :  { %v2426_v49 = vpop.permute.xlu1 %2425 }
 0x4ae   :  { %v2427_v50 = vsel %vm2421_vm6, %v2426_v49, %v2404_v46 }
 0x4af   :  { %2430 = vrot.lane.b32.xlu1 %v2427_v50, %s7719_s17 }
 0x51d   :  { %v2429_v51 = vpop.permute.xlu0 %2428 }
 0x51e   :  { %v2432_v52 = vsel %vm2421_vm6, %v2429_v51, %v8089_v43 }
 0x51f   :  { %2438 = vrot.lane.b32.xlu0 %v2432_v52, %s7720_s18 }
 0x521   :  { %v2431_v55 = vpop.permute.xlu1 %2430 }
 0x522   :  { %v2433_v58 = vsel %vm2421_vm6, %v2431_v55, %v2404_v46  ;;  %v2588_v46 = vand.u32 4294901760, %v2587_v34 }
 0x523   :  { %2440 = vrot.lane.b32.xlu1 %v2433_v58, %s7720_s18  ;;  %2448 = vrot.lane.b32.xlu0 %v2432_v52, %s7721_s21 }
 0x524   :  { %v7028_v49 = vpack.c.bf16 %v2588_v46, %v2581_v48 }
 0x527   :  { %2450 = vrot.lane.b32.xlu1 %v2433_v58, %s7721_s21  ;;  %2458 = vperm.xlu0 %7628, %v2419_v53  }
 0x52b   :  { %2463 = vperm.xlu1 %7629, %v2420_v1  }
 0x591   :  { %v2439_v10 = vpop.permute.xlu0 %2438 }
 0x592   :  { %v2444_v12 = vsel %vm8124_vm8, 0.0, %v2439_v10 }
 0x593   :  { %v2472_v14 = vand.u32 4294901760, %v2444_v12 }
 0x595   :  { %v8138_v18 = vsub.f32 %v2444_v12, %v2472_v14  ;;  %v2441_v19 = vpop.permute.xlu1 %2440  ;;  %v2449_v20 = vpop.permute.xlu0 %2448 }
 0x596   :  { %v2445_v21 = vsel %vm8124_vm8, 0.0, %v2441_v19  ;;  %v2454_v3 = vsel %vm8131_vm9, 0.0, %v2449_v20 }
 0x597   :  { %v2475_v6 = vand.u32 4294901760, %v2445_v21  ;;  %v2565_v15 = vand.u32 4294901760, %v8138_v18  ;;  %v2484_v24 = vand.u32 4294901760, %v2454_v3 }
 0x599   :  { %v8153_v22 = vpack.c.bf16 %v2475_v6, %v2472_v14  ;;  %v8155_v23 = vsub.f32 %v2445_v21, %v2475_v6  ;;  %v2451_v25 = vpop.permute.xlu1 %2450  ;;  %v2566_v31 = vsub.f32 %v8138_v18, %v2565_v15  ;;  %v2592_v33 = vsub.f32 %v2454_v3, %v2484_v24 }
 0x59a   :  { %v2455_v26 = vsel %vm8131_vm9, 0.0, %v2451_v25 }
 0x59b   :  { %v2572_v28 = vand.u32 4294901760, %v8155_v23  ;;  %v2487_v29 = vand.u32 4294901760, %v2455_v26  ;;  %7013 = vmatprep.subr.bf16.mxu0 %v8153_v22  ;;  %v2593_v39 = vand.u32 4294901760, %v2592_v33  ;;  %v2567_v40 = vand.u32 4294901760, %v2566_v31 }
 0x59c   :  { %7015 = vmatpush3.bf16.msra.mxu0 %v8153_v22  ;;  %v7036_v53 = vpack.c.bf16 %v8155_v23, %v8138_v18  ;;  %v3070_v18 = vsel %vm2466_vm7, %v6078_v41, 0 }
 0x59d   :  { %v2573_v32 = vsub.f32 %v8155_v23, %v2572_v28  ;;  %v2599_v59 = vsub.f32 %v2455_v26, %v2487_v29  ;;  %7017 = vmatprep.subr.bf16.mxu0 %v8160_v56  ;;  %v8175_v35 = vpack.c.bf16 %v2487_v29, %v2484_v24  ;;  %v2594_v47 = vsub.f32 %v2592_v33, %v2593_v39 }
 0x59e   :  { %v7060_v58 = vpack.c.bf16 %v2572_v28, %v2565_v15  ;;  %v8230_v19 = vand.u32 4294901760, %v3070_v18  ;;  %v3072_v23 = vsel %vm2466_vm7, %v6079_v9, 0 }
 0x59f   :  { %v2600_v36 = vand.u32 4294901760, %v2599_v59  ;;  %v2574_v37 = vand.u32 4294901760, %v2573_v32  ;;  %v2595_v51 = vand.u32 4294901760, %v2594_v47  ;;  %v7044_v55 = vpack.c.bf16 %v2599_v59, %v2592_v33 }
 0x5a0   :  { %7019 = vmatpush3.bf16.msra.mxu0 %v8160_v56  ;;  %v8235_v3 = vsub.f32 %v3070_v18, %v8230_v19  ;;  %v8253_v26 = vand.u32 4294901760, %v3072_v23 }
 0x5a1   :  { %7021 = vmatprep.subr.bf16.mxu0 %v8175_v35  ;;  %v2601_v43 = vsub.f32 %v2599_v59, %v2600_v36  ;;  %v7024_v44 = vpack.c.bf16 %v2574_v37, %v2567_v40 }
 0x5a2   :  { %v8264_v0 = vsub.f32 %v3072_v23, %v8253_v26 }
 0x5a3   :  { %v2602_v50 = vand.u32 4294901760, %v2601_v43 }
 0x5a4   :  { %7023 = vmatpush3.bf16.msra.mxu0 %v8175_v35  ;;  %v3157_v42 = vand.u32 4294901760, %v8264_v0 }
 0x5a5   :  { %7025 = vmatprep.subr.bf16.mxu0 %v7024_v44  ;;  %v7032_v52 = vpack.c.bf16 %v2602_v50, %v2595_v51 }
 0x5a6   :  { %v2459_v63 = vpop.permute.xlu0 %2458 }
 0x5a7   :  { %6389 = vmatmul.mubr.f32.vlgmr.msra.gmra.mrb[8].mxu0 %v2556_v45 }
 0x5a8   :  { %7027 = vmatpush3.bf16.msra.mxu0 %v7024_v44  ;;  %6403 = vmatprep.mubr.f32.mxu0 %v8107_v57 }
 0x5a9   :  { %7029 = vmatprep.subr.bf16.mxu0 %v7028_v49 }
 0x5ac   :  { %7031 = vmatpush3.bf16.msra.mxu0 %v7028_v49 }
 0x5ad   :  { %7033 = vmatprep.subr.bf16.mxu0 %v7032_v52 }
 0x5b0   :  { %7035 = vmatpush3.bf16.msra.mxu0 %v7032_v52 }
 0x5b1   :  { %7037 = vmatprep.subr.bf16.mxu0 %v7036_v53 }
 0x5b3   :  { %6404 = vmatmul.mubr.f32.vlgmr.msra.gmra.mrb[8].mxu0 %v8135_v16 }
 0x5b4   :  { %7039 = vmatpush3.bf16.msra.mxu0 %v7036_v53  ;;  %6418 = vmatprep.mubr.f32.mxu0 %v8113_v60  ;;  %v7068_v60 = vpack.c.bf16 %v2600_v36, %v2593_v39  ;;  %v3158_v53 = vsub.f32 %v8264_v0, %v3157_v42 }
 0x5b5   :  { %7041 = vmatprep.subr.bf16.mxu0 %v7040_v54 }
 0x5b8   :  { %7043 = vmatpush3.bf16.msra.mxu0 %v7040_v54 }
 0x5b9   :  { %7045 = vmatprep.subr.bf16.mxu0 %v7044_v55 }
 0x5bc   :  { %7047 = vmatpush3.bf16.msra.mxu0 %v7044_v55 }
 0x5bd   :  { %7049 = vmatprep.subr.bf16.mxu0 %v8153_v22 }
 0x5bf   :  { %6419 = vmatmul.mubr.f32.vlgmr.msra.gmra.mrb[8].mxu0 %v8147_v8  ;;  %v3147_v8 = vand.u32 4294901760, %v8235_v3 }
 0x5c0   :  { %7051 = vmatpush3.bf16.msra.mxu0 %v8153_v22  ;;  %6433 = vmatprep.mubr.f32.mxu0 %v2544_v61  ;;  %v2464_v61 = vpop.permute.xlu1 %2463 }
 0x5c1   :  { %7053 = vmatprep.subr.bf16.mxu0 %v8160_v56  ;;  %v3148_v15 = vsub.f32 %v8235_v3, %v3147_v8 }
 0x5c4   :  { %7055 = vmatpush3.bf16.msra.mxu0 %v8160_v56 }
 0x5c5   :  { %7057 = vmatprep.subr.bf16.mxu0 %v8175_v35 }
 0x5c8   :  { %7059 = vmatpush3.bf16.msra.mxu0 %v8175_v35 }
 0x5c9   :  { %7061 = vmatprep.subr.bf16.mxu0 %v7060_v58 }
 0x5cb   :  { %6434 = vmatmul.mubr.f32.vlgmr.msra.gmra.mrb[8].mxu0 %v2554_v30 }
 0x5cc   :  { %7063 = vmatpush3.bf16.msra.mxu0 %v7060_v58  ;;  %6448 = vmatprep.mubr.f32.mxu0 %v8107_v57 }
 0x5cd   :  { %7065 = vmatprep.subr.bf16.mxu0 %v7064_v62 }
 0x5d0   :  { %7067 = vmatpush3.bf16.msra.mxu0 %v7064_v62 }
 0x5d1   :  { %7069 = vmatprep.subr.bf16.mxu0 %v7068_v60 }
 0x5d4   :  { %7071 = vmatpush3.bf16.msra.mxu0 %v7068_v60 }
 0x5d5   :  { %7073 = vmatprep.subr.bf16.mxu0 %v8153_v22 }
 0x5d7   :  { %6449 = vmatmul.mubr.f32.vlgmr.msra.gmra.mrb[8].mxu0 %v8135_v16 }
 0x5d8   :  { %7075 = vmatpush3.bf16.msra.mxu0 %v8153_v22  ;;  %6463 = vmatprep.mubr.f32.mxu0 %v8107_v57  ;;  %v3149_v22 = vand.u32 4294901760, %v3148_v15 }
 0x5d9   :  { %7077 = vmatprep.subr.bf16.mxu0 %v8160_v56 }
 0x5da   :  { %6478 = vmatprep.mubr.f32.mxu1 %v3149_v22 }
 0x5dc   :  { %7079 = vmatpush3.bf16.msra.mxu0 %v8160_v56 }
 0x5dd   :  { %7081 = vmatprep.subr.bf16.mxu0 %v8175_v35 }
 0x5e0   :  { %7083 = vmatpush3.bf16.msra.mxu0 %v8175_v35 }
 0x5e3   :  { %6464 = vmatmul.mubr.f32.vlgmr.msra.gmra.mrb[8].mxu0 %v8135_v16 }
 0x6b6   :  { %v6465_v1 = vpop.f32.mrb[8].mxu0 }
 0x6b7   :  { %v7460_v2 = vadd.f32 %v6465_v1, %v2464_v61  ;;  %v3015_v4 = vpop.f32.mrb[9].mxu0 }
 0x6b8   :  { %v7461_v7 = vadd.f32 %v3015_v4, %v2459_v63  ;;  %v3159_v4 = vand.u32 4294901760, %v3158_v53 }
 0x6b9   :  { %v8212_v10 = vmax.f32 %v7460_v2, 0.0 }
 0x6ba   :  { %v8214_v11 = vmax.f32 %v7461_v7, 0.0 }
 0x6bb   :  { %3033 = vrot.lane.b32.xlu0 %v8212_v10, %s7719_s17  ;;  %v3084_v24 = vand.u32 4294901760, %v8212_v10 }
 0x6bc   :  { %3030 = vrot.lane.b32.xlu1 %v8214_v11, %s7719_s17  ;;  %v3081_v25 = vand.u32 4294901760, %v8214_v11 }
 0x6bd   :  { %v8256_v56 = vsub.f32 %v8212_v10, %v3084_v24 }
 0x6be   :  { %v8261_v30 = vsub.f32 %v8214_v11, %v3081_v25  ;;  %v8284_v48 = vpack.c.bf16 %v3084_v24, %v3081_v25 }
 0x6bf   :  { %v3189_v35 = vand.u32 4294901760, %v8256_v56 }
 0x6c0   :  { %v3182_v40 = vand.u32 4294901760, %v8261_v30 }
 0x6c1   :  { %v3190_v58 = vsub.f32 %v8256_v56, %v3189_v35 }
 0x6c2   :  { %v3183_v55 = vsub.f32 %v8261_v30, %v3182_v40 }
 0x6c3   :  { %v3191_v2 = vand.u32 4294901760, %v3190_v58 }
 0x6c4   :  { %v3184_v1 = vand.u32 4294901760, %v3183_v55 }
 0x72d   :  { %v3034_v57 = vpop.permute.xlu0 %3033 }
 0x72e   :  { %v3031_v12 = vpop.permute.xlu1 %3030  ;;  %v3035_v14 = vsel %vm2421_vm6, %v3034_v57, %v8212_v10 }
 0x72f   :  { %3038 = vrot.lane.b32.xlu0 %v3035_v14, %s7719_s17  ;;  %v3032_v16 = vsel %vm2421_vm6, %v3031_v12, %v8214_v11  ;;  %v7100_v14 = vpack.c.bf16 %v3191_v2, %v3184_v1 }
 0x730   :  { %3036 = vrot.lane.b32.xlu1 %v3032_v16, %s7719_s17 }
 0x7a1   :  { %v3039_v20 = vpop.permute.xlu0 %3038 }
 0x7a2   :  { %v3037_v17 = vpop.permute.xlu1 %3036  ;;  %v3041_v21 = vsel %vm2421_vm6, %v3039_v20, %v8212_v10 }
 0x7a3   :  { %3046 = vrot.lane.b32.xlu0 %v3041_v21, %s7720_s18  ;;  %v3040_v6 = vsel %vm2421_vm6, %v3037_v17, %v8214_v11  ;;  %v7112_v17 = vpack.c.bf16 %v8256_v56, %v8261_v30  ;;  %v6080_v30 = vld [vmem:[%s8811_s2 + $0x20] sm:$0xff] }
 0x7a4   :  { %3044 = vrot.lane.b32.xlu1 %v3040_v6, %s7720_s18 }
 0x7a7   :  { %3054 = vrot.lane.b32.xlu0 %v3041_v21, %s7721_s21 }
 0x7a8   :  { %3052 = vrot.lane.b32.xlu1 %v3040_v6, %s7721_s21 }
 0x7ab   :  { %3067 = vperm.xlu0 %7628, %v6079_v9   ;;  %v7136_v9 = vpack.c.bf16 %v3189_v35, %v3182_v40 }
 0x7ac   :  { %3062 = vperm.xlu1 %7629, %v6078_v41  }
 0x815   :  { %v3047_v27 = vpop.permute.xlu0 %3046 }
 0x816   :  { %v3051_v28 = vsel %vm8124_vm8, 0.0, %v3047_v27  ;;  %v3045_v29 = vpop.permute.xlu1 %3044 }
 0x817   :  { %v3078_v31 = vand.u32 4294901760, %v3051_v28  ;;  %v3050_v32 = vsel %vm8124_vm8, 0.0, %v3045_v29 }
 0x818   :  { %v3075_v33 = vand.u32 4294901760, %v3050_v32 }
 0x819   :  { %v8268_v59 = vsub.f32 %v3051_v28, %v3078_v31  ;;  %v3055_v34 = vpop.permute.xlu0 %3054 }
 0x81a   :  { %v8271_v36 = vpack.c.bf16 %v3078_v31, %v3075_v33  ;;  %v8273_v37 = vsub.f32 %v3050_v32, %v3075_v33  ;;  %v3059_v38 = vsel %vm8131_vm9, 0.0, %v3055_v34  ;;  %v3053_v39 = vpop.permute.xlu1 %3052 }
 0x81b   :  { %v3175_v43 = vand.u32 4294901760, %v8268_v59  ;;  %v3090_v44 = vand.u32 4294901760, %v3059_v38  ;;  %v3058_v45 = vsel %vm8131_vm9, 0.0, %v3053_v39 }
 0x81c   :  { %v3168_v46 = vand.u32 4294901760, %v8273_v37  ;;  %v3087_v47 = vand.u32 4294901760, %v3058_v45  ;;  %7085 = vmatprep.subr.bf16.mxu1 %v8271_v36  ;;  %v7108_v20 = vpack.c.bf16 %v8268_v59, %v8273_v37 }
 0x81d   :  { %v3176_v49 = vsub.f32 %v8268_v59, %v3175_v43  ;;  %v3202_v50 = vsub.f32 %v3059_v38, %v3090_v44  ;;  %7087 = vmatpush3.bf16.msra.mxu1 %v8271_v36 }
 0x81e   :  { %v3169_v51 = vsub.f32 %v8273_v37, %v3168_v46  ;;  %v3195_v52 = vsub.f32 %v3058_v45, %v3087_v47  ;;  %7089 = vmatprep.subr.bf16.mxu1 %v8284_v48  ;;  %v8293_v54 = vpack.c.bf16 %v3090_v44, %v3087_v47  ;;  %v7132_v6 = vpack.c.bf16 %v3175_v43, %v3168_v46  ;;  %v6081_v37 = vld [vmem:[%s8811_s2 + $0x28] sm:$0xff] }
 0x81f   :  { %v3203_v62 = vand.u32 4294901760, %v3202_v50  ;;  %v3177_v63 = vand.u32 4294901760, %v3176_v49  ;;  %v3675_v40 = vsel %vm2466_vm7, %v6081_v37, 0 }
 0x820   :  { %v3196_v60 = vand.u32 4294901760, %v3195_v52  ;;  %v3170_v61 = vand.u32 4294901760, %v3169_v51  ;;  %v7116_v21 = vpack.c.bf16 %v3202_v50, %v3195_v52  ;;  %v8365_v44 = vand.u32 4294901760, %v3675_v40 }
 0x821   :  { %7091 = vmatpush3.bf16.msra.mxu1 %v8284_v48  ;;  %v3204_v7 = vsub.f32 %v3202_v50, %v3203_v62 }
 0x822   :  { %7093 = vmatprep.subr.bf16.mxu1 %v8293_v54  ;;  %v3197_v57 = vsub.f32 %v3195_v52, %v3196_v60  ;;  %v7096_v12 = vpack.c.bf16 %v3177_v63, %v3170_v61  ;;  %v8374_v50 = vsub.f32 %v3675_v40, %v8365_v44 }
 0x823   :  { %v3205_v41 = vand.u32 4294901760, %v3204_v7 }
 0x824   :  { %v3198_v16 = vand.u32 4294901760, %v3197_v57  ;;  %v3760_v2 = vand.u32 4294901760, %v8374_v50 }
 0x825   :  { %7095 = vmatpush3.bf16.msra.mxu1 %v8293_v54 }
 0x826   :  { %7097 = vmatprep.subr.bf16.mxu1 %v7096_v12  ;;  %v7104_v18 = vpack.c.bf16 %v3205_v41, %v3198_v16 }
 0x828   :  { %6479 = vmatmul.mubr.f32.vlgmr.msra.gmra.mrb[8].mxu1 %v3159_v4 }
 0x829   :  { %7099 = vmatpush3.bf16.msra.mxu1 %v7096_v12  ;;  %6493 = vmatprep.mubr.f32.mxu1 %v8230_v19 }
 0x82a   :  { %7101 = vmatprep.subr.bf16.mxu1 %v7100_v14 }
 0x82b   :  { %v3063_v22 = vpop.permute.xlu1 %3062 }
 0x82d   :  { %7103 = vmatpush3.bf16.msra.mxu1 %v7100_v14 }
 0x82e   :  { %7105 = vmatprep.subr.bf16.mxu1 %v7104_v18 }
 0x831   :  { %7107 = vmatpush3.bf16.msra.mxu1 %v7104_v18 }
 0x832   :  { %7109 = vmatprep.subr.bf16.mxu1 %v7108_v20 }
 0x834   :  { %6494 = vmatmul.mubr.f32.vlgmr.msra.gmra.mrb[8].mxu1 %v8253_v26 }
 0x835   :  { %7111 = vmatpush3.bf16.msra.mxu1 %v7108_v20  ;;  %6508 = vmatprep.mubr.f32.mxu1 %v8235_v3  ;;  %v7140_v3 = vpack.c.bf16 %v3203_v62, %v3196_v60 }
 0x836   :  { %7113 = vmatprep.subr.bf16.mxu1 %v7112_v17 }
 0x839   :  { %7115 = vmatpush3.bf16.msra.mxu1 %v7112_v17 }
 0x83a   :  { %7117 = vmatprep.subr.bf16.mxu1 %v7116_v21 }
 0x83d   :  { %7119 = vmatpush3.bf16.msra.mxu1 %v7116_v21 }
 0x83e   :  { %7121 = vmatprep.subr.bf16.mxu1 %v8271_v36 }
 0x840   :  { %6509 = vmatmul.mubr.f32.vlgmr.msra.gmra.mrb[8].mxu1 %v8264_v0  ;;  %v3673_v0 = vsel %vm2466_vm7, %v6080_v30, 0 }
 0x841   :  { %7123 = vmatpush3.bf16.msra.mxu1 %v8271_v36  ;;  %6523 = vmatprep.mubr.f32.mxu1 %v3147_v8  ;;  %v3068_v8 = vpop.permute.xlu0 %3067  ;;  %v8346_v31 = vand.u32 4294901760, %v3673_v0 }
 0x842   :  { %7125 = vmatprep.subr.bf16.mxu1 %v8284_v48 }
 0x843   :  { %v8350_v34 = vsub.f32 %v3673_v0, %v8346_v31 }
 0x845   :  { %7127 = vmatpush3.bf16.msra.mxu1 %v8284_v48 }
 0x846   :  { %7129 = vmatprep.subr.bf16.mxu1 %v8293_v54 }
 0x849   :  { %7131 = vmatpush3.bf16.msra.mxu1 %v8293_v54 }
 0x84a   :  { %7133 = vmatprep.subr.bf16.mxu1 %v7132_v6 }
 0x84c   :  { %6524 = vmatmul.mubr.f32.vlgmr.msra.gmra.mrb[8].mxu1 %v3157_v42 }
 0x84d   :  { %7135 = vmatpush3.bf16.msra.mxu1 %v7132_v6  ;;  %6538 = vmatprep.mubr.f32.mxu1 %v8230_v19  ;;  %v3761_v6 = vsub.f32 %v8374_v50, %v3760_v2 }
 0x84e   :  { %7137 = vmatprep.subr.bf16.mxu1 %v7136_v9 }
 0x851   :  { %7139 = vmatpush3.bf16.msra.mxu1 %v7136_v9 }
 0x852   :  { %7141 = vmatprep.subr.bf16.mxu1 %v7140_v3 }
 0x855   :  { %7143 = vmatpush3.bf16.msra.mxu1 %v7140_v3 }
 0x856   :  { %7145 = vmatprep.subr.bf16.mxu1 %v8271_v36 }
 0x858   :  { %6539 = vmatmul.mubr.f32.vlgmr.msra.gmra.mrb[8].mxu1 %v8253_v26 }
 0x859   :  { %7147 = vmatpush3.bf16.msra.mxu1 %v8271_v36  ;;  %6553 = vmatprep.mubr.f32.mxu1 %v8230_v19  ;;  %v3750_v36 = vand.u32 4294901760, %v8350_v34 }
 0x85a   :  { %7149 = vmatprep.subr.bf16.mxu1 %v8284_v48 }
 0x85b   :  { %v3751_v38 = vsub.f32 %v8350_v34, %v3750_v36 }
 0x85d   :  { %7151 = vmatpush3.bf16.msra.mxu1 %v8284_v48  ;;  %v3752_v39 = vand.u32 4294901760, %v3751_v38 }
 0x85e   :  { %7153 = vmatprep.subr.bf16.mxu1 %v8293_v54 }
 0x85f   :  { %6568 = vmatprep.mubr.f32.mxu0 %v3752_v39 }
 0x861   :  { %7155 = vmatpush3.bf16.msra.mxu1 %v8293_v54 }
 0x864   :  { %6554 = vmatmul.mubr.f32.vlgmr.msra.gmra.mrb[8].mxu1 %v8253_v26 }
 0x937   :  { %v6555_v15 = vpop.f32.mrb[8].mxu1 }
 0x938   :  { %v7462_v23 = vadd.f32 %v6555_v15, %v3068_v8  ;;  %v3618_v24 = vpop.f32.mrb[9].mxu1 }
 0x939   :  { %v7463_v25 = vadd.f32 %v3618_v24, %v3063_v22 }
 0x93a   :  { %v3629_v27 = vmax.f32 %v7462_v23, 0.0 }
 0x93b   :  { %v3628_v56 = vmax.f32 %v7463_v25, 0.0 }
 0x93c   :  { %3636 = vrot.lane.b32.xlu0 %v3629_v27, %s7719_s17  ;;  %v3687_v42 = vand.u32 4294901760, %v3629_v27 }
 0x93d   :  { %3633 = vrot.lane.b32.xlu1 %v3628_v56, %s7719_s17  ;;  %v3684_v43 = vand.u32 4294901760, %v3628_v56 }
 0x93e   :  { %v8367_v46 = vsub.f32 %v3629_v27, %v3687_v42 }
 0x93f   :  { %v8371_v49 = vsub.f32 %v3628_v56, %v3684_v43  ;;  %v8392_v12 = vpack.c.bf16 %v3687_v42, %v3684_v43 }
 0x940   :  { %v3792_v58 = vand.u32 4294901760, %v8367_v46 }
 0x941   :  { %v3785_v1 = vand.u32 4294901760, %v8371_v49 }
 0x942   :  { %v3793_v3 = vsub.f32 %v8367_v46, %v3792_v58 }
 0x943   :  { %v3786_v9 = vsub.f32 %v8371_v49, %v3785_v1 }
 0x944   :  { %v3794_v25 = vand.u32 4294901760, %v3793_v3 }
 0x945   :  { %v3787_v24 = vand.u32 4294901760, %v3786_v9 }
 0x9ae   :  { %v3637_v19 = vpop.permute.xlu0 %3636 }
 0x9af   :  { %v3634_v28 = vpop.permute.xlu1 %3633  ;;  %v3638_v29 = vsel %vm2421_vm6, %v3637_v19, %v3629_v27 }
 0x9b0   :  { %3641 = vrot.lane.b32.xlu0 %v3638_v29, %s7719_s17  ;;  %v3635_v26 = vsel %vm2421_vm6, %v3634_v28, %v3628_v56  ;;  %v3762_v28 = vand.u32 4294901760, %v3761_v6  ;;  %v7172_v29 = vpack.c.bf16 %v3794_v25, %v3787_v24 }
 0x9b1   :  { %3639 = vrot.lane.b32.xlu1 %v3635_v26, %s7719_s17 }
 0xa22   :  { %v3642_v32 = vpop.permute.xlu0 %3641 }
 0xa23   :  { %v3640_v33 = vpop.permute.xlu1 %3639  ;;  %v3644_v59 = vsel %vm2421_vm6, %v3642_v32, %v3629_v27 }
 0xa24   :  { %3649 = vrot.lane.b32.xlu0 %v3644_v59, %s7720_s18  ;;  %v3643_v35 = vsel %vm2421_vm6, %v3640_v33, %v3628_v56  ;;  %v7184_v33 = vpack.c.bf16 %v8367_v46, %v8371_v49 }
 0xa25   :  { %3647 = vrot.lane.b32.xlu1 %v3643_v35, %s7720_s18 }
 0xa28   :  { %3657 = vrot.lane.b32.xlu0 %v3644_v59, %s7721_s21 }
 0xa29   :  { %3655 = vrot.lane.b32.xlu1 %v3643_v35, %s7721_s21 }
 0xa2c   :  { %3670 = vperm.xlu0 %7628, %v6081_v37   ;;  %v7208_v37 = vpack.c.bf16 %v3792_v58, %v3785_v1 }
 0xa2d   :  { %3665 = vperm.xlu1 %7629, %v6080_v30  }
 0xa96   :  { %v3650_v45 = vpop.permute.xlu0 %3649 }
 0xa97   :  { %v3654_v47 = vsel %vm8124_vm8, 0.0, %v3650_v45  ;;  %v3648_v48 = vpop.permute.xlu1 %3647 }
 0xa98   :  { %v3681_v51 = vand.u32 4294901760, %v3654_v47  ;;  %v3653_v52 = vsel %vm8124_vm8, 0.0, %v3648_v48 }
 0xa99   :  { %v3678_v53 = vand.u32 4294901760, %v3653_v52 }
 0xa9a   :  { %v8378_v54 = vsub.f32 %v3654_v47, %v3681_v51  ;;  %v3658_v55 = vpop.permute.xlu0 %3657 }
 0xa9b   :  { %v8381_v62 = vpack.c.bf16 %v3681_v51, %v3678_v53  ;;  %v8383_v60 = vsub.f32 %v3653_v52, %v3678_v53  ;;  %v3662_v61 = vsel %vm8131_vm9, 0.0, %v3658_v55  ;;  %v3656_v63 = vpop.permute.xlu1 %3655 }
 0xa9c   :  { %v3778_v4 = vand.u32 4294901760, %v8378_v54  ;;  %v3693_v7 = vand.u32 4294901760, %v3662_v61  ;;  %v3661_v57 = vsel %vm8131_vm9, 0.0, %v3656_v63 }
 0xa9d   :  { %v3771_v14 = vand.u32 4294901760, %v8383_v60  ;;  %v3690_v16 = vand.u32 4294901760, %v3661_v57  ;;  %7157 = vmatprep.subr.bf16.mxu0 %v8381_v62  ;;  %v7180_v32 = vpack.c.bf16 %v8378_v54, %v8383_v60 }
 0xa9e   :  { %v3779_v41 = vsub.f32 %v8378_v54, %v3778_v4  ;;  %v3805_v18 = vsub.f32 %v3662_v61, %v3693_v7  ;;  %7159 = vmatpush3.bf16.msra.mxu0 %v8381_v62 }
 0xa9f   :  { %v3772_v20 = vsub.f32 %v8383_v60, %v3771_v14  ;;  %v3798_v17 = vsub.f32 %v3661_v57, %v3690_v16  ;;  %7161 = vmatprep.subr.bf16.mxu0 %v8392_v12  ;;  %v8400_v21 = vpack.c.bf16 %v3693_v7, %v3690_v16  ;;  %v7204_v35 = vpack.c.bf16 %v3778_v4, %v3771_v14  ;;  %v6083_v60 = vld [vmem:[%s8811_s2 + $0x38] sm:$0xff] }
 0xaa0   :  { %v3806_v8 = vand.u32 4294901760, %v3805_v18  ;;  %v3780_v23 = vand.u32 4294901760, %v3779_v41  ;;  %v4280_v1 = vsel %vm2466_vm7, %v6083_v60, 0 }
 0xaa1   :  { %v3799_v15 = vand.u32 4294901760, %v3798_v17  ;;  %v3773_v22 = vand.u32 4294901760, %v3772_v20  ;;  %v7188_v59 = vpack.c.bf16 %v3805_v18, %v3798_v17  ;;  %v8489_v7 = vand.u32 4294901760, %v4280_v1 }
 0xaa2   :  { %7163 = vmatpush3.bf16.msra.mxu0 %v8392_v12  ;;  %v3807_v27 = vsub.f32 %v3805_v18, %v3806_v8 }
 0xaa3   :  { %7165 = vmatprep.subr.bf16.mxu0 %v8400_v21  ;;  %v3800_v56 = vsub.f32 %v3798_v17, %v3799_v15  ;;  %v7168_v19 = vpack.c.bf16 %v3780_v23, %v3773_v22  ;;  %v8500_v18 = vsub.f32 %v4280_v1, %v8489_v7 }
 0xaa4   :  { %v3808_v30 = vand.u32 4294901760, %v3807_v27 }
 0xaa5   :  { %v3801_v26 = vand.u32 4294901760, %v3800_v56  ;;  %v4365_v25 = vand.u32 4294901760, %v8500_v18 }
 0xaa6   :  { %7167 = vmatpush3.bf16.msra.mxu0 %v8400_v21 }
 0xaa7   :  { %7169 = vmatprep.subr.bf16.mxu0 %v7168_v19  ;;  %v7176_v0 = vpack.c.bf16 %v3808_v30, %v3801_v26 }
 0xaa9   :  { %6569 = vmatmul.mubr.f32.vlgmr.msra.gmra.mrb[10].mxu0 %v3762_v28 }
 0xaaa   :  { %7171 = vmatpush3.bf16.msra.mxu0 %v7168_v19  ;;  %6583 = vmatprep.mubr.f32.mxu0 %v8346_v31 }
 0xaab   :  { %7173 = vmatprep.subr.bf16.mxu0 %v7172_v29 }
 0xaac   :  { %v3666_v39 = vpop.permute.xlu1 %3665 }
 0xaae   :  { %7175 = vmatpush3.bf16.msra.mxu0 %v7172_v29 }
 0xaaf   :  { %7177 = vmatprep.subr.bf16.mxu0 %v7176_v0 }
 0xab2   :  { %7179 = vmatpush3.bf16.msra.mxu0 %v7176_v0 }
 0xab3   :  { %7181 = vmatprep.subr.bf16.mxu0 %v7180_v32 }
 0xab5   :  { %6584 = vmatmul.mubr.f32.vlgmr.msra.gmra.mrb[10].mxu0 %v8365_v44 }
 0xab6   :  { %7183 = vmatpush3.bf16.msra.mxu0 %v7180_v32  ;;  %6598 = vmatprep.mubr.f32.mxu0 %v8350_v34  ;;  %v7212_v34 = vpack.c.bf16 %v3806_v8, %v3799_v15 }
 0xab7   :  { %7185 = vmatprep.subr.bf16.mxu0 %v7184_v33 }
 0xaba   :  { %7187 = vmatpush3.bf16.msra.mxu0 %v7184_v33 }
 0xabb   :  { %7189 = vmatprep.subr.bf16.mxu0 %v7188_v59 }
 0xabe   :  { %7191 = vmatpush3.bf16.msra.mxu0 %v7188_v59 }
 0xabf   :  { %7193 = vmatprep.subr.bf16.mxu0 %v8381_v62 }
 0xac1   :  { %6599 = vmatmul.mubr.f32.vlgmr.msra.gmra.mrb[10].mxu0 %v8374_v50 }
 0xac2   :  { %7195 = vmatpush3.bf16.msra.mxu0 %v8381_v62  ;;  %6613 = vmatprep.mubr.f32.mxu0 %v3750_v36  ;;  %v3671_v36 = vpop.permute.xlu0 %3670 }
 0xac3   :  { %7197 = vmatprep.subr.bf16.mxu0 %v8392_v12 }
 0xac6   :  { %7199 = vmatpush3.bf16.msra.mxu0 %v8392_v12 }
 0xac7   :  { %7201 = vmatprep.subr.bf16.mxu0 %v8400_v21 }
 0xaca   :  { %7203 = vmatpush3.bf16.msra.mxu0 %v8400_v21 }
 0xacb   :  { %7205 = vmatprep.subr.bf16.mxu0 %v7204_v35 }
 0xacd   :  { %6614 = vmatmul.mubr.f32.vlgmr.msra.gmra.mrb[10].mxu0 %v3760_v2 }
 0xace   :  { %7207 = vmatpush3.bf16.msra.mxu0 %v7204_v35  ;;  %6628 = vmatprep.mubr.f32.mxu0 %v8346_v31  ;;  %v4366_v35 = vsub.f32 %v8500_v18, %v4365_v25 }
 0xacf   :  { %7209 = vmatprep.subr.bf16.mxu0 %v7208_v37 }
 0xad2   :  { %7211 = vmatpush3.bf16.msra.mxu0 %v7208_v37 }
 0xad3   :  { %7213 = vmatprep.subr.bf16.mxu0 %v7212_v34 }
 0xad6   :  { %7215 = vmatpush3.bf16.msra.mxu0 %v7212_v34 }
 0xad7   :  { %7217 = vmatprep.subr.bf16.mxu0 %v8381_v62 }
 0xad9   :  { %6629 = vmatmul.mubr.f32.vlgmr.msra.gmra.mrb[10].mxu0 %v8365_v44 }
 0xada   :  { %7219 = vmatpush3.bf16.msra.mxu0 %v8381_v62  ;;  %6643 = vmatprep.mubr.f32.mxu0 %v8346_v31 }
 0xadb   :  { %7221 = vmatprep.subr.bf16.mxu0 %v8392_v12 }
 0xade   :  { %7223 = vmatpush3.bf16.msra.mxu0 %v8392_v12 }
 0xadf   :  { %7225 = vmatprep.subr.bf16.mxu0 %v8400_v21 }
 0xae2   :  { %7227 = vmatpush3.bf16.msra.mxu0 %v8400_v21 }
 0xae5   :  { %6644 = vmatmul.mubr.f32.vlgmr.msra.gmra.mrb[10].mxu0 %v8365_v44 }
 0xbb8   :  { %v6645_v38 = vpop.f32.mrb[10].mxu0 }
 0xbb9   :  { %v7464_v40 = vadd.f32 %v6645_v38, %v3671_v36  ;;  %v4221_v42 = vpop.f32.mrb[11].mxu0 }
 0xbba   :  { %v7465_v43 = vadd.f32 %v4221_v42, %v3666_v39 }
 0xbbb   :  { %v4232_v45 = vmax.f32 %v7464_v40, 0.0 }
 0xbbc   :  { %v4231_v46 = vmax.f32 %v7465_v43, 0.0 }
 0xbbd   :  { %v8447_v31 = vadd.f32 %v4232_v45, %v8212_v10 }
 0xbbe   :  { %v8450_v47 = vadd.f32 %v4231_v46, %v8214_v11  ;;  %v6082_v11 = vld [vmem:[%s8811_s2 + $0x30] sm:$0xff] }
 0xbbf   :  { %4241 = vrot.lane.b32.xlu0 %v8447_v31, %s7719_s17  ;;  %v4278_v50 = vsel %vm2466_vm7, %v6082_v11, 0  ;;  %v4292_v2 = vand.u32 4294901760, %v8447_v31 }
 0xbc0   :  { %4238 = vrot.lane.b32.xlu1 %v8450_v47, %s7719_s17  ;;  %v8466_v51 = vand.u32 4294901760, %v4278_v50  ;;  %v4289_v4 = vand.u32 4294901760, %v8450_v47 }
 0xbc1   :  { %v8492_v12 = vsub.f32 %v8447_v31, %v4292_v2 }
 0xbc2   :  { %v8471_v55 = vsub.f32 %v4278_v50, %v8466_v51  ;;  %v8497_v41 = vsub.f32 %v8450_v47, %v4289_v4  ;;  %v8520_v26 = vpack.c.bf16 %v4292_v2, %v4289_v4 }
 0xbc3   :  { %v4397_v3 = vand.u32 4294901760, %v8492_v12 }
 0xbc4   :  { %v4355_v62 = vand.u32 4294901760, %v8471_v55  ;;  %v4390_v24 = vand.u32 4294901760, %v8497_v41 }
 0xbc5   :  { %v4398_v34 = vsub.f32 %v8492_v12, %v4397_v3 }
 0xbc6   :  { %v4356_v61 = vsub.f32 %v8471_v55, %v4355_v62  ;;  %v4391_v37 = vsub.f32 %v8497_v41, %v4390_v24 }
 0xbc7   :  { %v4399_v43 = vand.u32 4294901760, %v4398_v34 }
 0xbc8   :  { %v4357_v63 = vand.u32 4294901760, %v4356_v61  ;;  %v4392_v42 = vand.u32 4294901760, %v4391_v37 }
 0xbca   :  { %6658 = vmatprep.mubr.f32.mxu1 %v4357_v63 }
 0xc31   :  { %v4242_v44 = vpop.permute.xlu0 %4241 }
 0xc32   :  { %v4239_v48 = vpop.permute.xlu1 %4238  ;;  %v4243_v49 = vsel %vm2421_vm6, %v4242_v44, %v8447_v31 }
 0xc33   :  { %4246 = vrot.lane.b32.xlu0 %v4243_v49, %s7719_s17  ;;  %v4240_v10 = vsel %vm2421_vm6, %v4239_v48, %v8450_v47  ;;  %v4367_v48 = vand.u32 4294901760, %v4366_v35  ;;  %v7244_v49 = vpack.c.bf16 %v4399_v43, %v4392_v42 }
 0xc34   :  { %4244 = vrot.lane.b32.xlu1 %v4240_v10, %s7719_s17 }
 0xca5   :  { %v4247_v52 = vpop.permute.xlu0 %4246 }
 0xca6   :  { %v4245_v53 = vpop.permute.xlu1 %4244  ;;  %v4249_v54 = vsel %vm2421_vm6, %v4247_v52, %v8447_v31 }
 0xca7   :  { %4254 = vrot.lane.b32.xlu0 %v4249_v54, %s7720_s18  ;;  %v4248_v58 = vsel %vm2421_vm6, %v4245_v53, %v8450_v47  ;;  %v7256_v53 = vpack.c.bf16 %v8492_v12, %v8497_v41  ;;  %v6084_v41 = vld [vmem:[%s8811_s2 + $0x40] sm:$0xff] }
 0xca8   :  { %4252 = vrot.lane.b32.xlu1 %v4248_v58, %s7720_s18 }
 0xcab   :  { %4262 = vrot.lane.b32.xlu0 %v4249_v54, %s7721_s21 }
 0xcac   :  { %4260 = vrot.lane.b32.xlu1 %v4248_v58, %s7721_s21 }
 0xcaf   :  { %4275 = vperm.xlu0 %7628, %v6083_v60   ;;  %v7280_v60 = vpack.c.bf16 %v4397_v3, %v4390_v24 }
 0xcb0   :  { %4270 = vperm.xlu1 %7629, %v6082_v11  }
 0xd19   :  { %v4255_v57 = vpop.permute.xlu0 %4254 }
 0xd1a   :  { %v4259_v14 = vsel %vm8124_vm8, 0.0, %v4255_v57  ;;  %v4253_v16 = vpop.permute.xlu1 %4252 }
 0xd1b   :  { %v4286_v20 = vand.u32 4294901760, %v4259_v14  ;;  %v4258_v17 = vsel %vm8124_vm8, 0.0, %v4253_v16 }
 0xd1c   :  { %v4283_v21 = vand.u32 4294901760, %v4258_v17 }
 0xd1d   :  { %v8504_v6 = vsub.f32 %v4259_v14, %v4286_v20  ;;  %v4263_v9 = vpop.permute.xlu0 %4262 }
 0xd1e   :  { %v8507_v8 = vpack.c.bf16 %v4286_v20, %v4283_v21  ;;  %v8509_v15 = vsub.f32 %v4258_v17, %v4283_v21  ;;  %v4267_v22 = vsel %vm8131_vm9, 0.0, %v4263_v9  ;;  %v4261_v23 = vpop.permute.xlu1 %4260 }
 0xd1f   :  { %v4383_v27 = vand.u32 4294901760, %v8504_v6  ;;  %v4298_v56 = vand.u32 4294901760, %v4267_v22  ;;  %v4266_v19 = vsel %vm8131_vm9, 0.0, %v4261_v23 }
 0xd20   :  { %v4376_v28 = vand.u32 4294901760, %v8509_v15  ;;  %v4295_v29 = vand.u32 4294901760, %v4266_v19  ;;  %7229 = vmatprep.subr.bf16.mxu1 %v8507_v8  ;;  %v7252_v52 = vpack.c.bf16 %v8504_v6, %v8509_v15 }
 0xd21   :  { %v4384_v30 = vsub.f32 %v8504_v6, %v4383_v27  ;;  %v4410_v0 = vsub.f32 %v4267_v22, %v4298_v56  ;;  %7231 = vmatpush3.bf16.msra.mxu1 %v8507_v8 }
 0xd22   :  { %v4377_v32 = vsub.f32 %v8509_v15, %v4376_v28  ;;  %v4403_v33 = vsub.f32 %v4266_v19, %v4295_v29  ;;  %7233 = vmatprep.subr.bf16.mxu1 %v8520_v26  ;;  %v8526_v59 = vpack.c.bf16 %v4298_v56, %v4295_v29  ;;  %v7276_v58 = vpack.c.bf16 %v4383_v27, %v4376_v28  ;;  %v6085_v15 = vld [vmem:[%s8811_s2 + $0x48] sm:$0xff] }
 0xd23   :  { %v4411_v36 = vand.u32 4294901760, %v4410_v0  ;;  %v4385_v40 = vand.u32 4294901760, %v4384_v30  ;;  %v4883_v24 = vsel %vm2466_vm7, %v6085_v15, 0 }
 0xd24   :  { %v4404_v38 = vand.u32 4294901760, %v4403_v33  ;;  %v4378_v39 = vand.u32 4294901760, %v4377_v32  ;;  %v7260_v54 = vpack.c.bf16 %v4410_v0, %v4403_v33  ;;  %v8601_v56 = vand.u32 4294901760, %v4883_v24 }
 0xd25   :  { %7235 = vmatpush3.bf16.msra.mxu1 %v8520_v26  ;;  %v4412_v45 = vsub.f32 %v4410_v0, %v4411_v36 }
 0xd26   :  { %7237 = vmatprep.subr.bf16.mxu1 %v8526_v59  ;;  %v4405_v46 = vsub.f32 %v4403_v33, %v4404_v38  ;;  %v7240_v44 = vpack.c.bf16 %v4385_v40, %v4378_v39  ;;  %v8610_v0 = vsub.f32 %v4883_v24, %v8601_v56 }
 0xd27   :  { %v4413_v11 = vand.u32 4294901760, %v4412_v45 }
 0xd28   :  { %v4406_v10 = vand.u32 4294901760, %v4405_v46  ;;  %v4968_v43 = vand.u32 4294901760, %v8610_v0 }
 0xd29   :  { %7239 = vmatpush3.bf16.msra.mxu1 %v8526_v59 }
 0xd2a   :  { %7241 = vmatprep.subr.bf16.mxu1 %v7240_v44  ;;  %v7248_v50 = vpack.c.bf16 %v4413_v11, %v4406_v10 }
 0xd2c   :  { %6659 = vmatmul.mubr.f32.vlgmr.msra.gmra.mrb[10].mxu1 %v4367_v48 }
 0xd2d   :  { %7243 = vmatpush3.bf16.msra.mxu1 %v7240_v44  ;;  %6673 = vmatprep.mubr.f32.mxu1 %v8466_v51 }
 0xd2e   :  { %7245 = vmatprep.subr.bf16.mxu1 %v7244_v49 }
 0xd2f   :  { %v4271_v63 = vpop.permute.xlu1 %4270 }
 0xd31   :  { %7247 = vmatpush3.bf16.msra.mxu1 %v7244_v49 }
 0xd32   :  { %7249 = vmatprep.subr.bf16.mxu1 %v7248_v50 }
 0xd35   :  { %7251 = vmatpush3.bf16.msra.mxu1 %v7248_v50 }
 0xd36   :  { %7253 = vmatprep.subr.bf16.mxu1 %v7252_v52 }
 0xd38   :  { %6674 = vmatmul.mubr.f32.vlgmr.msra.gmra.mrb[10].mxu1 %v8489_v7 }
 0xd39   :  { %7255 = vmatpush3.bf16.msra.mxu1 %v7252_v52  ;;  %6688 = vmatprep.mubr.f32.mxu1 %v8471_v55  ;;  %v7284_v55 = vpack.c.bf16 %v4411_v36, %v4404_v38 }
 0xd3a   :  { %7257 = vmatprep.subr.bf16.mxu1 %v7256_v53 }
 0xd3d   :  { %7259 = vmatpush3.bf16.msra.mxu1 %v7256_v53 }
 0xd3e   :  { %7261 = vmatprep.subr.bf16.mxu1 %v7260_v54 }
 0xd41   :  { %7263 = vmatpush3.bf16.msra.mxu1 %v7260_v54 }
 0xd42   :  { %7265 = vmatprep.subr.bf16.mxu1 %v8507_v8 }
 0xd44   :  { %6689 = vmatmul.mubr.f32.vlgmr.msra.gmra.mrb[10].mxu1 %v8500_v18  ;;  %v4881_v18 = vsel %vm2466_vm7, %v6084_v41, 0 }
 0xd45   :  { %7267 = vmatpush3.bf16.msra.mxu1 %v8507_v8  ;;  %6703 = vmatprep.mubr.f32.mxu1 %v4355_v62  ;;  %v4276_v62 = vpop.permute.xlu0 %4275  ;;  %v8582_v20 = vand.u32 4294901760, %v4881_v18 }
 0xd46   :  { %7269 = vmatprep.subr.bf16.mxu1 %v8520_v26 }
 0xd47   :  { %v8586_v9 = vsub.f32 %v4881_v18, %v8582_v20 }
 0xd49   :  { %7271 = vmatpush3.bf16.msra.mxu1 %v8520_v26 }
 0xd4a   :  { %7273 = vmatprep.subr.bf16.mxu1 %v8526_v59 }
 0xd4d   :  { %7275 = vmatpush3.bf16.msra.mxu1 %v8526_v59 }
 0xd4e   :  { %7277 = vmatprep.subr.bf16.mxu1 %v7276_v58 }
 0xd50   :  { %6704 = vmatmul.mubr.f32.vlgmr.msra.gmra.mrb[10].mxu1 %v4365_v25 }
 0xd51   :  { %7279 = vmatpush3.bf16.msra.mxu1 %v7276_v58  ;;  %6718 = vmatprep.mubr.f32.mxu1 %v8466_v51  ;;  %v4969_v58 = vsub.f32 %v8610_v0, %v4968_v43 }
 0xd52   :  { %7281 = vmatprep.subr.bf16.mxu1 %v7280_v60 }
 0xd55   :  { %7283 = vmatpush3.bf16.msra.mxu1 %v7280_v60 }
 0xd56   :  { %7285 = vmatprep.subr.bf16.mxu1 %v7284_v55 }
 0xd59   :  { %7287 = vmatpush3.bf16.msra.mxu1 %v7284_v55 }
 0xd5a   :  { %7289 = vmatprep.subr.bf16.mxu1 %v8507_v8 }
 0xd5c   :  { %6719 = vmatmul.mubr.f32.vlgmr.msra.gmra.mrb[10].mxu1 %v8489_v7 }
 0xd5d   :  { %7291 = vmatpush3.bf16.msra.mxu1 %v8507_v8  ;;  %6733 = vmatprep.mubr.f32.mxu1 %v8466_v51  ;;  %v4958_v8 = vand.u32 4294901760, %v8586_v9 }
 0xd5e   :  { %7293 = vmatprep.subr.bf16.mxu1 %v8520_v26 }
 0xd5f   :  { %v4959_v22 = vsub.f32 %v8586_v9, %v4958_v8 }
 0xd61   :  { %7295 = vmatpush3.bf16.msra.mxu1 %v8520_v26  ;;  %v4960_v23 = vand.u32 4294901760, %v4959_v22 }
 0xd62   :  { %7297 = vmatprep.subr.bf16.mxu1 %v8526_v59 }
 0xd63   :  { %6748 = vmatprep.mubr.f32.mxu0 %v4960_v23 }
 0xd65   :  { %7299 = vmatpush3.bf16.msra.mxu1 %v8526_v59 }
 0xd68   :  { %6734 = vmatmul.mubr.f32.vlgmr.msra.gmra.mrb[10].mxu1 %v8489_v7 }
 0xe3b   :  { %v6735_v61 = vpop.f32.mrb[10].mxu1 }
 0xe3c   :  { %v7466_v1 = vadd.f32 %v6735_v61, %v4276_v62  ;;  %v4826_v2 = vpop.f32.mrb[11].mxu1 }
 0xe3d   :  { %v7467_v4 = vadd.f32 %v4826_v2, %v4271_v63 }
 0xe3e   :  { %v4837_v57 = vmax.f32 %v7466_v1, 0.0 }
 0xe3f   :  { %v4836_v12 = vmax.f32 %v7467_v4, 0.0 }
 0xe40   :  { %4844 = vrot.lane.b32.xlu0 %v4837_v57, %s7719_s17  ;;  %v4895_v25 = vand.u32 4294901760, %v4837_v57 }
 0xe41   :  { %4841 = vrot.lane.b32.xlu1 %v4836_v12, %s7719_s17  ;;  %v4892_v27 = vand.u32 4294901760, %v4836_v12 }
 0xe42   :  { %v8603_v28 = vsub.f32 %v4837_v57, %v4895_v25 }
 0xe43   :  { %v8607_v30 = vsub.f32 %v4836_v12, %v4892_v27  ;;  %v8628_v48 = vpack.c.bf16 %v4895_v25, %v4892_v27 }
 0xe44   :  { %v5000_v34 = vand.u32 4294901760, %v8603_v28 }
 0xe45   :  { %v4993_v42 = vand.u32 4294901760, %v8607_v30 }
 0xe46   :  { %v5001_v55 = vsub.f32 %v8603_v28, %v5000_v34 }
 0xe47   :  { %v4994_v60 = vsub.f32 %v8607_v30, %v4993_v42 }
 0xe48   :  { %v5002_v4 = vand.u32 4294901760, %v5001_v55 }
 0xe49   :  { %v4995_v2 = vand.u32 4294901760, %v4994_v60 }
 0xeb2   :  { %v4845_v51 = vpop.permute.xlu0 %4844 }
 0xeb3   :  { %v4842_v14 = vpop.permute.xlu1 %4841  ;;  %v4846_v16 = vsel %vm2421_vm6, %v4845_v51, %v4837_v57 }
 0xeb4   :  { %4849 = vrot.lane.b32.xlu0 %v4846_v16, %s7719_s17  ;;  %v4843_v7 = vsel %vm2421_vm6, %v4842_v14, %v4836_v12  ;;  %v4970_v14 = vand.u32 4294901760, %v4969_v58  ;;  %v7316_v16 = vpack.c.bf16 %v5002_v4, %v4995_v2 }
 0xeb5   :  { %4847 = vrot.lane.b32.xlu1 %v4843_v7, %s7719_s17 }
 0xf26   :  { %v4850_v17 = vpop.permute.xlu0 %4849 }
 0xf27   :  { %v4848_v21 = vpop.permute.xlu1 %4847  ;;  %v4852_v6 = vsel %vm2421_vm6, %v4850_v17, %v4837_v57 }
 0xf28   :  { %4857 = vrot.lane.b32.xlu0 %v4852_v6, %s7720_s18  ;;  %v4851_v3 = vsel %vm2421_vm6, %v4848_v21, %v4836_v12  ;;  %v7328_v21 = vpack.c.bf16 %v8603_v28, %v8607_v30 }
 0xf29   :  { %4855 = vrot.lane.b32.xlu1 %v4851_v3, %s7720_s18 }
 0xf2c   :  { %4865 = vrot.lane.b32.xlu0 %v4852_v6, %s7721_s21 }
 0xf2d   :  { %4863 = vrot.lane.b32.xlu1 %v4851_v3, %s7721_s21 }
 0xf30   :  { %4878 = vperm.xlu0 %7628, %v6085_v15   ;;  %v7352_v15 = vpack.c.bf16 %v5000_v34, %v4993_v42 }
 0xf31   :  { %4873 = vperm.xlu1 %7629, %v6084_v41  }
 0xf9a   :  { %v4858_v19 = vpop.permute.xlu0 %4857 }
 0xf9b   :  { %v4862_v29 = vsel %vm8124_vm8, 0.0, %v4858_v19  ;;  %v4856_v26 = vpop.permute.xlu1 %4855 }
 0xf9c   :  { %v4889_v32 = vand.u32 4294901760, %v4862_v29  ;;  %v4861_v33 = vsel %vm8124_vm8, 0.0, %v4856_v26 }
 0xf9d   :  { %v4886_v59 = vand.u32 4294901760, %v4861_v33 }
 0xf9e   :  { %v8614_v35 = vsub.f32 %v4862_v29, %v4889_v32  ;;  %v4866_v37 = vpop.permute.xlu0 %4865 }
 0xf9f   :  { %v8617_v36 = vpack.c.bf16 %v4889_v32, %v4886_v59  ;;  %v8619_v38 = vsub.f32 %v4861_v33, %v4886_v59  ;;  %v4870_v39 = vsel %vm8131_vm9, 0.0, %v4866_v37  ;;  %v4864_v40 = vpop.permute.xlu1 %4863 }
 0xfa0   :  { %v4986_v45 = vand.u32 4294901760, %v8614_v35  ;;  %v4901_v46 = vand.u32 4294901760, %v4870_v39  ;;  %v4869_v44 = vsel %vm8131_vm9, 0.0, %v4864_v40 }
 0xfa1   :  { %v4979_v49 = vand.u32 4294901760, %v8619_v38  ;;  %v4898_v10 = vand.u32 4294901760, %v4869_v44  ;;  %7301 = vmatprep.subr.bf16.mxu0 %v8617_v36  ;;  %v7324_v17 = vpack.c.bf16 %v8614_v35, %v8619_v38 }
 0xfa2   :  { %v4987_v11 = vsub.f32 %v8614_v35, %v4986_v45  ;;  %v5013_v50 = vsub.f32 %v4870_v39, %v4901_v46  ;;  %7303 = vmatpush3.bf16.msra.mxu0 %v8617_v36 }
 0xfa3   :  { %v4980_v52 = vsub.f32 %v8619_v38, %v4979_v49  ;;  %v5006_v53 = vsub.f32 %v4869_v44, %v4898_v10  ;;  %7305 = vmatprep.subr.bf16.mxu0 %v8628_v48  ;;  %v8636_v54 = vpack.c.bf16 %v4901_v46, %v4898_v10  ;;  %v7348_v3 = vpack.c.bf16 %v4986_v45, %v4979_v49  ;;  %v6087_v38 = vld [vmem:[%s8811_s2 + $0x58] sm:$0xff] }
 0xfa4   :  { %v5014_v62 = vand.u32 4294901760, %v5013_v50  ;;  %v4988_v1 = vand.u32 4294901760, %v4987_v11  ;;  %v5488_v42 = vsel %vm2466_vm7, %v6087_v38, 0 }
 0xfa5   :  { %v5007_v61 = vand.u32 4294901760, %v5006_v53  ;;  %v4981_v63 = vand.u32 4294901760, %v4980_v52  ;;  %v7332_v6 = vpack.c.bf16 %v5013_v50, %v5006_v53  ;;  %v8713_v46 = vand.u32 4294901760, %v5488_v42 }
 0xfa6   :  { %7307 = vmatpush3.bf16.msra.mxu0 %v8628_v48  ;;  %v5015_v57 = vsub.f32 %v5013_v50, %v5014_v62 }
 0xfa7   :  { %7309 = vmatprep.subr.bf16.mxu0 %v8636_v54  ;;  %v5008_v12 = vsub.f32 %v5006_v53, %v5007_v61  ;;  %v7312_v51 = vpack.c.bf16 %v4988_v1, %v4981_v63  ;;  %v8722_v50 = vsub.f32 %v5488_v42, %v8713_v46 }
 0xfa8   :  { %v5016_v41 = vand.u32 4294901760, %v5015_v57 }
 0xfa9   :  { %v5009_v7 = vand.u32 4294901760, %v5008_v12  ;;  %v5573_v4 = vand.u32 4294901760, %v8722_v50 }
 0xfaa   :  { %7311 = vmatpush3.bf16.msra.mxu0 %v8636_v54 }
 0xfab   :  { %7313 = vmatprep.subr.bf16.mxu0 %v7312_v51  ;;  %v7320_v18 = vpack.c.bf16 %v5016_v41, %v5009_v7  ;;  %v5574_v13 = vsub.f32 %v8722_v50, %v5573_v4 }
 0xfad   :  { %6749 = vmatmul.mubr.f32.vlgmr.msra.gmra.mrb[12].mxu0 %v4970_v14 }
 0xfae   :  { %7315 = vmatpush3.bf16.msra.mxu0 %v7312_v51  ;;  %6763 = vmatprep.mubr.f32.mxu0 %v8582_v20 }
 0xfaf   :  { %7317 = vmatprep.subr.bf16.mxu0 %v7316_v16 }
 0xfb0   :  { %v4874_v23 = vpop.permute.xlu1 %4873 }
 0xfb2   :  { %7319 = vmatpush3.bf16.msra.mxu0 %v7316_v16 }
 0xfb3   :  { %7321 = vmatprep.subr.bf16.mxu0 %v7320_v18 }
 0xfb6   :  { %7323 = vmatpush3.bf16.msra.mxu0 %v7320_v18 }
 0xfb7   :  { %7325 = vmatprep.subr.bf16.mxu0 %v7324_v17 }
 0xfb9   :  { %6764 = vmatmul.mubr.f32.vlgmr.msra.gmra.mrb[12].mxu0 %v8601_v56 }
 0xfba   :  { %7327 = vmatpush3.bf16.msra.mxu0 %v7324_v17  ;;  %6778 = vmatprep.mubr.f32.mxu0 %v8586_v9  ;;  %v7356_v9 = vpack.c.bf16 %v5014_v62, %v5007_v61 }
 0xfbb   :  { %7329 = vmatprep.subr.bf16.mxu0 %v7328_v21 }
 0xfbe   :  { %7331 = vmatpush3.bf16.msra.mxu0 %v7328_v21 }
 0xfbf   :  { %7333 = vmatprep.subr.bf16.mxu0 %v7332_v6 }
 0xfc2   :  { %7335 = vmatpush3.bf16.msra.mxu0 %v7332_v6 }
 0xfc3   :  { %7337 = vmatprep.subr.bf16.mxu0 %v8617_v36 }
 0xfc5   :  { %6779 = vmatmul.mubr.f32.vlgmr.msra.gmra.mrb[12].mxu0 %v8610_v0 }
 0xfc6   :  { %7339 = vmatpush3.bf16.msra.mxu0 %v8617_v36  ;;  %6793 = vmatprep.mubr.f32.mxu0 %v4958_v8  ;;  %v4879_v8 = vpop.permute.xlu0 %4878 }
 0xfc7   :  { %7341 = vmatprep.subr.bf16.mxu0 %v8628_v48 }
 0xfca   :  { %7343 = vmatpush3.bf16.msra.mxu0 %v8628_v48 }
 0xfcb   :  { %7345 = vmatprep.subr.bf16.mxu0 %v8636_v54 }
 0xfce   :  { %7347 = vmatpush3.bf16.msra.mxu0 %v8636_v54 }
 0xfcf   :  { %7349 = vmatprep.subr.bf16.mxu0 %v7348_v3 }
 0xfd1   :  { %6794 = vmatmul.mubr.f32.vlgmr.msra.gmra.mrb[12].mxu0 %v4968_v43 }
 0xfd2   :  { %7351 = vmatpush3.bf16.msra.mxu0 %v7348_v3  ;;  %6808 = vmatprep.mubr.f32.mxu0 %v8582_v20 }
 0xfd3   :  { %7353 = vmatprep.subr.bf16.mxu0 %v7352_v15 }
 0xfd6   :  { %7355 = vmatpush3.bf16.msra.mxu0 %v7352_v15 }
 0xfd7   :  { %7357 = vmatprep.subr.bf16.mxu0 %v7356_v9 }
 0xfda   :  { %7359 = vmatpush3.bf16.msra.mxu0 %v7356_v9 }
 0xfdb   :  { %7361 = vmatprep.subr.bf16.mxu0 %v8617_v36 }
 0xfdd   :  { %6809 = vmatmul.mubr.f32.vlgmr.msra.gmra.mrb[12].mxu0 %v8601_v56 }
 0xfde   :  { %7363 = vmatpush3.bf16.msra.mxu0 %v8617_v36  ;;  %6823 = vmatprep.mubr.f32.mxu0 %v8582_v20 }
 0xfdf   :  { %7365 = vmatprep.subr.bf16.mxu0 %v8628_v48 }
 0xfe2   :  { %7367 = vmatpush3.bf16.msra.mxu0 %v8628_v48 }
 0xfe3   :  { %7369 = vmatprep.subr.bf16.mxu0 %v8636_v54 }
 0xfe6   :  { %7371 = vmatpush3.bf16.msra.mxu0 %v8636_v54 }
 0xfe9   :  { %6824 = vmatmul.mubr.f32.vlgmr.msra.gmra.mrb[12].mxu0 %v8601_v56 }
0x10bc   :  { %v6825_v22 = vpop.f32.mrb[12].mxu0 }
0x10bd   :  { %v7468_v24 = vadd.f32 %v6825_v22, %v4879_v8  ;;  %v5429_v25 = vpop.f32.mrb[13].mxu0 }
0x10be   :  { %v7469_v27 = vadd.f32 %v5429_v25, %v4874_v23 }
0x10bf   :  { %v5440_v19 = vmax.f32 %v7468_v24, 0.0 }
0x10c0   :  { %v5439_v28 = vmax.f32 %v7469_v27, 0.0 }
0x10c1   :  { %v5442_v20 = vadd.f32 %v5440_v19, %v8447_v31  ;;  %v6086_v31 = vld [vmem:[%s8811_s2 + $0x50] sm:$0xff]  ;;  %s7723_s2 = smov [#allocation5]  }
0x10c2   :  { %v5441_v29 = vadd.f32 %v5439_v28, %v8450_v47  ;;  %v5486_v47 = vsel %vm2466_vm7, %v6086_v31, 0  ;;  %v5575_v28 = vand.u32 4294901760, %v5574_v13 }
0x10c3   :  { %5449 = vrot.lane.b32.xlu0 %v5442_v20, %s7719_s17  ;;  %v8694_v32 = vand.u32 4294901760, %v5486_v47  ;;  %v5500_v43 = vand.u32 4294901760, %v5442_v20 }
0x10c4   :  { %5446 = vrot.lane.b32.xlu1 %v5441_v29, %s7719_s17  ;;  %v5497_v45 = vand.u32 4294901760, %v5441_v29 }
0x10c5   :  { %v8698_v37 = vsub.f32 %v5486_v47, %v8694_v32  ;;  %v8715_v48 = vsub.f32 %v5442_v20, %v5500_v43 }
0x10c6   :  { %v8719_v11 = vsub.f32 %v5441_v29, %v5497_v45  ;;  %v8742_v16 = vpack.c.bf16 %v5500_v43, %v5497_v45 }
0x10c7   :  { %v5563_v36 = vand.u32 4294901760, %v8698_v37  ;;  %v5605_v55 = vand.u32 4294901760, %v8715_v48 }
0x10c8   :  { %v5598_v2 = vand.u32 4294901760, %v8719_v11 }
0x10c9   :  { %v5564_v39 = vsub.f32 %v8698_v37, %v5563_v36  ;;  %v5606_v3 = vsub.f32 %v8715_v48, %v5605_v55 }
0x10ca   :  { %v5599_v6 = vsub.f32 %v8719_v11, %v5598_v2 }
0x10cb   :  { %v5565_v40 = vand.u32 4294901760, %v5564_v39  ;;  %v5607_v24 = vand.u32 4294901760, %v5606_v3 }
0x10cc   :  { %v5600_v23 = vand.u32 4294901760, %v5599_v6 }
0x10cd   :  { %6838 = vmatprep.mubr.f32.mxu1 %v5565_v40 }
0x1135   :  { %v5450_v26 = vpop.permute.xlu0 %5449 }
0x1136   :  { %v5447_v30 = vpop.permute.xlu1 %5446  ;;  %v5451_v56 = vsel %vm2421_vm6, %v5450_v26, %v5442_v20 }
0x1137   :  { %5454 = vrot.lane.b32.xlu0 %v5451_v56, %s7719_s17  ;;  %v5448_v0 = vsel %vm2421_vm6, %v5447_v30, %v5441_v29 }
0x1138   :  { %5452 = vrot.lane.b32.xlu1 %v5448_v0, %s7719_s17  ;;  %v7400_v0 = vpack.c.bf16 %v8715_v48, %v8719_v11  ;;  %s6054_s17 = sshll.u32 %s7723_s2, 4  ;;  %s6055_s17 = int_to_ptr.vmem [resolvable:$true] %s6054_s17 }
0x1139   :  { %p7689_p9 = scmp.lt.s32.totalorder %s6055_s17, %s6055_s17 }
0x11a9   :  { %v5455_v33 = vpop.permute.xlu0 %5454 }
0x11aa   :  { %v5453_v59 = vpop.permute.xlu1 %5452  ;;  %v5457_v35 = vsel %vm2421_vm6, %v5455_v33, %v5442_v20  ;;  %v7388_v20 = vpack.c.bf16 %v5607_v24, %v5600_v23  ;;  %v7424_v33 = vpack.c.bf16 %v5605_v55, %v5598_v2 }
0x11ab   :  { %5462 = vrot.lane.b32.xlu0 %v5457_v35, %s7720_s18  ;;  %v5456_v34 = vsel %vm2421_vm6, %v5453_v59, %v5441_v29 }
0x11ac   :  { %5460 = vrot.lane.b32.xlu1 %v5456_v34, %s7720_s18  ;;  %s7684_s18 = scalar_lea.vmem %s6055_s17, 256 }
0x11ad   :  { %p7685_p8 = scmp.ne.s32.totalorder %s6055_s17, %s7684_s18  ;;  %p7690_p10 = scmp.lt.s32.totalorder %s7684_s18, %s7684_s18 }
0x11af   :  { %5470 = vrot.lane.b32.xlu0 %v5457_v35, %s7721_s21  ;;  %p7691_p11 = por %p7690_p10, %p7689_p9 }
0x11b0   :  { %5468 = vrot.lane.b32.xlu1 %v5456_v34, %s7721_s21 }
0x11b1   :  { %p7692_p12 = pnand %p7691_p11, %p7685_p8 }
0x11b3   :  { %5483 = vperm.xlu0 %7628, %v6087_v38  }
0x11b4   :  { %5478 = vperm.xlu1 %7629, %v6086_v31  }
0x121d   :  { %v5463_v44 = vpop.permute.xlu0 %5462 }
0x121e   :  { %v5467_v49 = vsel %vm8124_vm8, 0.0, %v5463_v44  ;;  %v5461_v10 = vpop.permute.xlu1 %5460 }
0x121f   :  { %v5494_v52 = vand.u32 4294901760, %v5467_v49  ;;  %v5466_v53 = vsel %vm8124_vm8, 0.0, %v5461_v10 }
0x1220   :  { %v5491_v54 = vand.u32 4294901760, %v5466_v53 }
0x1221   :  { %v8726_v58 = vsub.f32 %v5467_v49, %v5494_v52  ;;  %v5471_v60 = vpop.permute.xlu0 %5470 }
0x1222   :  { %v8729_v62 = vpack.c.bf16 %v5494_v52, %v5491_v54  ;;  %v8731_v61 = vsub.f32 %v5466_v53, %v5491_v54  ;;  %v5475_v63 = vsel %vm8131_vm9, 0.0, %v5471_v60  ;;  %v5469_v1 = vpop.permute.xlu1 %5468 }
0x1223   :  { %v5591_v5 = vand.u32 4294901760, %v8726_v58  ;;  %v5506_v57 = vand.u32 4294901760, %v5475_v63  ;;  %v5474_v12 = vsel %vm8131_vm9, 0.0, %v5469_v1 }
0x1224   :  { %v5584_v51 = vand.u32 4294901760, %v8731_v61  ;;  %v5503_v14 = vand.u32 4294901760, %v5474_v12  ;;  %7373 = vmatprep.subr.bf16.mxu1 %v8729_v62  ;;  %v7396_v56 = vpack.c.bf16 %v8726_v58, %v8731_v61 }
0x1225   :  { %v5592_v7 = vsub.f32 %v8726_v58, %v5591_v5  ;;  %v5618_v41 = vsub.f32 %v5475_v63, %v5506_v57  ;;  %7375 = vmatpush3.bf16.msra.mxu1 %v8729_v62 }
0x1226   :  { %v5585_v18 = vsub.f32 %v8731_v61, %v5584_v51  ;;  %v5611_v17 = vsub.f32 %v5474_v12, %v5503_v14  ;;  %7377 = vmatprep.subr.bf16.mxu1 %v8742_v16  ;;  %v8748_v21 = vpack.c.bf16 %v5506_v57, %v5503_v14  ;;  %v7420_v47 = vpack.c.bf16 %v5591_v5, %v5584_v51 }
0x1227   :  { %v5619_v15 = vand.u32 4294901760, %v5618_v41  ;;  %v5593_v22 = vand.u32 4294901760, %v5592_v7 }
0x1228   :  { %v5612_v9 = vand.u32 4294901760, %v5611_v17  ;;  %v5586_v8 = vand.u32 4294901760, %v5585_v18  ;;  %v7404_v31 = vpack.c.bf16 %v5618_v41, %v5611_v17 }
0x1229   :  { %7379 = vmatpush3.bf16.msra.mxu1 %v8742_v16  ;;  %v5620_v25 = vsub.f32 %v5618_v41, %v5619_v15 }
0x122a   :  { %7381 = vmatprep.subr.bf16.mxu1 %v8748_v21  ;;  %v5613_v27 = vsub.f32 %v5611_v17, %v5612_v9  ;;  %v7384_v19 = vpack.c.bf16 %v5593_v22, %v5586_v8  ;;  %v7428_v59 = vpack.c.bf16 %v5619_v15, %v5612_v9 }
0x122b   :  { %v5621_v26 = vand.u32 4294901760, %v5620_v25 }
0x122c   :  { %v5614_v29 = vand.u32 4294901760, %v5613_v27 }
0x122d   :  { %7383 = vmatpush3.bf16.msra.mxu1 %v8748_v21 }
0x122e   :  { %7385 = vmatprep.subr.bf16.mxu1 %v7384_v19  ;;  %v7392_v30 = vpack.c.bf16 %v5621_v26, %v5614_v29 }
0x1230   :  { %6839 = vmatmul.mubr.f32.vlgmr.msra.gmra.mrb[12].mxu1 %v5575_v28 }
0x1231   :  { %7387 = vmatpush3.bf16.msra.mxu1 %v7384_v19  ;;  %6853 = vmatprep.mubr.f32.mxu1 %v8694_v32 }
0x1232   :  { %7389 = vmatprep.subr.bf16.mxu1 %v7388_v20  ;;  %v5484_v35 = vpop.permute.xlu0 %5483 }
0x1233   :  { %v5479_v34 = vpop.permute.xlu1 %5478 }
0x1235   :  { %7391 = vmatpush3.bf16.msra.mxu1 %v7388_v20 }
0x1236   :  { %7393 = vmatprep.subr.bf16.mxu1 %v7392_v30 }
0x1239   :  { %7395 = vmatpush3.bf16.msra.mxu1 %v7392_v30 }
0x123a   :  { %7397 = vmatprep.subr.bf16.mxu1 %v7396_v56 }
0x123c   :  { %6854 = vmatmul.mubr.f32.vlgmr.msra.gmra.mrb[12].mxu1 %v8713_v46 }
0x123d   :  { %7399 = vmatpush3.bf16.msra.mxu1 %v7396_v56  ;;  %6868 = vmatprep.mubr.f32.mxu1 %v8698_v37 }
0x123e   :  { %7401 = vmatprep.subr.bf16.mxu1 %v7400_v0 }
0x1241   :  { %7403 = vmatpush3.bf16.msra.mxu1 %v7400_v0 }
0x1242   :  { %7405 = vmatprep.subr.bf16.mxu1 %v7404_v31 }
0x1245   :  { %7407 = vmatpush3.bf16.msra.mxu1 %v7404_v31 }
0x1246   :  { %7409 = vmatprep.subr.bf16.mxu1 %v8729_v62 }
0x1248   :  { %6869 = vmatmul.mubr.f32.vlgmr.msra.gmra.mrb[12].mxu1 %v8722_v50 }
0x1249   :  { %7411 = vmatpush3.bf16.msra.mxu1 %v8729_v62  ;;  %6883 = vmatprep.mubr.f32.mxu1 %v5563_v36 }
0x124a   :  { %7413 = vmatprep.subr.bf16.mxu1 %v8742_v16 }
0x124d   :  { %7415 = vmatpush3.bf16.msra.mxu1 %v8742_v16 }
0x124e   :  { %7417 = vmatprep.subr.bf16.mxu1 %v8748_v21 }
0x1251   :  { %7419 = vmatpush3.bf16.msra.mxu1 %v8748_v21 }
0x1252   :  { %7421 = vmatprep.subr.bf16.mxu1 %v7420_v47 }
0x1254   :  { %6884 = vmatmul.mubr.f32.vlgmr.msra.gmra.mrb[12].mxu1 %v5573_v4 }
0x1255   :  { %7423 = vmatpush3.bf16.msra.mxu1 %v7420_v47  ;;  %6898 = vmatprep.mubr.f32.mxu1 %v8694_v32 }
0x1256   :  { %7425 = vmatprep.subr.bf16.mxu1 %v7424_v33 }
0x1259   :  { %7427 = vmatpush3.bf16.msra.mxu1 %v7424_v33 }
0x125a   :  { %7429 = vmatprep.subr.bf16.mxu1 %v7428_v59 }
0x125d   :  { %7431 = vmatpush3.bf16.msra.mxu1 %v7428_v59 }
0x125e   :  { %7433 = vmatprep.subr.bf16.mxu1 %v8729_v62 }
0x1260   :  { %6899 = vmatmul.mubr.f32.vlgmr.msra.gmra.mrb[12].mxu1 %v8713_v46 }
0x1261   :  { %7435 = vmatpush3.bf16.msra.mxu1 %v8729_v62  ;;  %6913 = vmatprep.mubr.f32.mxu1 %v8694_v32 }
0x1262   :  { %7437 = vmatprep.subr.bf16.mxu1 %v8742_v16 }
0x1265   :  { %7439 = vmatpush3.bf16.msra.mxu1 %v8742_v16 }
0x1266   :  { %7441 = vmatprep.subr.bf16.mxu1 %v8748_v21 }
0x1269   :  { %7443 = vmatpush3.bf16.msra.mxu1 %v8748_v21 }
0x126c   :  { %6914 = vmatmul.mubr.f32.vlgmr.msra.gmra.mrb[12].mxu1 %v8713_v46 }
0x133f   :  { %v6915_v37 = vpop.f32.mrb[12].mxu1 }
0x1340   :  { %v7470_v36 = vadd.f32 %v6915_v37, %v5484_v35  ;;  %v6034_v38 = vpop.f32.mrb[13].mxu1 }
0x1341   :  { %v7471_v39 = vadd.f32 %v6034_v38, %v5479_v34 }
0x1342   :  { %v6045_v32 = vmax.f32 %v7470_v36, 0.0 }
0x1343   :  { %v6044_v40 = vmax.f32 %v7471_v39, 0.0 }
0x1344   :  { %6048 = vst.msk [vmem:[#allocation5 + $0x8] sm:$0xff] %vm6046_vm10, %v6045_v32 }
0x1345   :  { %6047 = vst.msk [vmem:[#allocation5] sm:$0xff] %vm6046_vm10, %v6044_v40 }
0x1346   :  { %7695 = shalt.err (!%p7692_p12)
}
0x1347   :  { %s7696_s21 = scalar_lea.hbm %s8812_s3, 256 }
0x1348   :  { %p7697_p13 = scmp.ne.s32.totalorder %s8812_s3, %s7696_s21  ;;  %p7700_p0 = scmp.lt.u32.totalorder %s7696_s21, %s8812_s3 }
0x134a   :  { %p7702_p1 = pnand %p7700_p0, %p7697_p13 }
0x134c   :  { %7705 = shalt.err (!%p7702_p1)
}
0x134d   :  { %6060 = dma.vmem_to_hbm [thread:$0]  %s6055_s17, 256, %s8812_s3, [#allocation4], %s7711_s22, %s7711_s22, %s7712_s23  }
0x134e   :  { %7708 = dma.done.wait [#allocation4], 256  }
0x134f   :  { %7709 = vsyncadd [#allocation4], 4294967040 }
0x1350   :  { %6064 = vsyncpa [#allocation3], 1 }
0x1351   :  { %6065 = vsyncpa [#allocation4], 1 }

</bundles_post_ra>
